<compile_context>
chip_gen: v7x
topology: tpu7x:2x2x1
jax: 0.10.0
libtpu: 0.0.40
codegen_flags: <defaults>
</compile_context>

<pallas_src>
import jax
import jax.numpy as jnp
from jax import lax
from jax.experimental import pallas as pl
from jax.experimental.pallas import tpu as pltpu
import numpy as np


def gcn_generator_kernel(x_ref, w_ref, out_ref):
    """One grid step == one packed block of Bb batch elements, all in VMEM."""
    Bb, N, H = x_ref.shape
    w = w_ref[...]                                            # (H, H)

    row = lax.broadcasted_iota(jnp.int32, (N, N), 0)
    col = lax.broadcasted_iota(jnp.int32, (N, N), 1)
    colv = lax.broadcasted_iota(jnp.int32, (1, N), 1)         # lane indices
    eye = (row == col).astype(jnp.float32)                    # (N, N)

    # First GraphConv with adj == I  =>  relu(x @ W).  Batches are stacked on
    # the MXU M dimension: (Bb*N, H) @ (H, H).
    x = x_ref[...].reshape(Bb * N, H)
    x = jnp.maximum(jnp.dot(x, w, preferred_element_type=jnp.float32), 0.0)
    x = x.reshape(Bb, N, H)

    # Working adjacency (symmetric at every step).  Tiny -> kept as a value.
    adj = jnp.broadcast_to(eye[None], (Bb, N, N))

    # adj_output: rows are written straight into the VMEM-resident out block;
    # only the lower triangle (+diag) is written in the loop, the upper
    # triangle is filled with a single transpose at the end.
    out_ref[...] = jnp.broadcast_to(eye[None], (Bb, N, N))

    # N is a compile-time constant; fully unroll the sequential node loop.
    for i in range(1, N):
        x_i = x[:, i, :]                                      # (Bb, H)
        # prob[b, j] = <x[b, j], x[b, i]>  -- row-only VPU dot + lane reduce
        # (replaces the previous full (N, N) Gram matmul).
        prob = jnp.sum(x * x_i[:, None, :], axis=-1)          # (Bb, N)

        # adj_output[i, :i] = prob  (row store only; column half deferred).
        out_row = jnp.where(colv < i, prob, (colv == i).astype(jnp.float32))
        out_ref[:, i:i + 1, :] = out_row[:, None, :]

        # adj[i, :i] = prob ; adj[:i, i] = prob.  Masks are trace-time consts.
        maskr = ((row == i) & (col < i))[None]
        maskc = ((col == i) & (row < i))[None]
        adj = jnp.where(maskr, prob[:, None, :], adj)
        adj = jnp.where(maskc, prob[:, :, None], adj)

        # preprocess(): D^-1/2 A D^-1/2.  adj is symmetric, so column sums ==
        # row sums; reducing along both axes avoids an explicit (N,1)->(1,N)
        # relayout (reviewer flagged this choice as minor either way).
        dinv_r = lax.rsqrt(jnp.sum(adj, axis=2, keepdims=True))   # (Bb, N, 1)
        dinv_c = lax.rsqrt(jnp.sum(adj, axis=1, keepdims=True))   # (Bb, 1, N)
        adj = adj * dinv_r * dinv_c

        # GraphConv + ReLU: relu((adj @ x) @ W); the W matmul is stacked over
        # batch to fill the MXU M dimension.
        y = jnp.einsum('bij,bjh->bih', adj, x,
                       preferred_element_type=jnp.float32)
        y = jnp.dot(y.reshape(Bb * N, H), w,
                    preferred_element_type=jnp.float32)
        x = jnp.maximum(y, 0.0).reshape(Bb, N, H)

    # Symmetrize adj_output: upper triangle = transpose of the lower triangle
    # (one batched minor-dim transpose instead of N strided column stores).
    lower = out_ref[...]
    out_ref[...] = jnp.where((col > row)[None],
                             jnp.swapaxes(lower, 1, 2), lower)


def gcn_generator(x, w, *, block_b=None):
    B, N, H = x.shape
    assert w.shape == (H, H)

    if block_b is None:
        # Pack several batch elements per grid step to fill the MXU M dim
        # (the biggest lever at small N/H), but keep >= 2 grid blocks when B
        # allows so both v7x TensorCores get work.
        target = max(1, min(8, B // 2)) if B >= 4 else B
        block_b = 1
        for cand in range(min(target, B), 0, -1):
            if B % cand == 0:
                block_b = cand
                break
    grid_b = B // block_b

    return pl.pallas_call(
        gcn_generator_kernel,
        out_shape=jax.ShapeDtypeStruct((B, N, N), jnp.float32),
        grid=(grid_b,),
        in_specs=[
            pl.BlockSpec((block_b, N, H), lambda b: (b, 0, 0)),
            pl.BlockSpec((H, H), lambda b: (0, 0)),
        ],
        out_specs=pl.BlockSpec((block_b, N, N), lambda b: (b, 0, 0)),
        compiler_params=pltpu.CompilerParams(
            dimension_semantics=("parallel",)),
    )(x, w)


def gcn_generator_reference(x, w):
    """Pure-JAX replica of the PyTorch forward (for validation)."""
    B, N, H = x.shape
    eye = jnp.eye(N, dtype=jnp.float32)

    def per_batch(xb):
        xb = jnp.maximum(xb @ w, 0.0)
        adj, adj_out = eye, eye
        for i in range(1, N):
            prob = xb[:i] @ xb[i]                       # (i,)
            adj_out = adj_out.at[i, :i].set(prob).at[:i, i].set(prob)
            adj = adj.at[i, :i].set(prob).at[:i, i].set(prob)
            dinv = jnp.sum(adj, axis=1) ** -0.5
            adj = adj * dinv[:, None] * dinv[None, :]
            xb = jnp.maximum((adj @ xb) @ w, 0.0)
        return adj_out

    return jax.vmap(per_batch)(x)


if __name__ == "__main__":
    B, N, H = 2, 8, 32  # batch, nodes, hidden_dim

    key = jax.random.PRNGKey(0)
    kx, kw = jax.random.split(key)

    # Xavier-uniform init with gain = calculate_gain('relu') = sqrt(2).
    gain = float(np.sqrt(2.0))
    bound = gain * float(np.sqrt(6.0 / (H + H)))
    w = jax.random.uniform(kw, (H, H), jnp.float32, minval=-bound, maxval=bound)

    x = jax.random.normal(kx, (B, N, H), jnp.float32)

    out = gcn_generator(x, w)
    out = jax.block_until_ready(out)

    ref = gcn_generator_reference(x, w)
    np.testing.assert_allclose(np.asarray(out), np.asarray(ref),
                               rtol=1e-4, atol=1e-4)

    print("KERNEL_OK")
</pallas_src>

<mosaic_0001>
module attributes {stable_mosaic.version = 11 : i64} {
  func.func @gcn_generator_kernel(%arg0: i32, %arg1: memref<2x8x32xf32, #tpu.memory_space<vmem>>, %arg2: memref<32x32xf32, #tpu.memory_space<vmem>>, %arg3: memref<2x8x8xf32, #tpu.memory_space<vmem>>) attributes {dimension_semantics = [#tpu.dimension_semantics<parallel>], iteration_bounds = array<i64: 1>, scalar_prefetch = 0 : i64, scratch_operands = 0 : i64, tpu.core_type = #tpu.core_type<tc>, window_params = [{transform_indices = @transform_0, window_bounds = array<i64: 2, 8, 32>}, {pipeline_mode = #tpu.pipeline_mode<synchronous>, transform_indices = @transform_1, window_bounds = array<i64: 32, 32>}, {transform_indices = @transform_2, window_bounds = array<i64: 2, 8, 8>}]} {
    %c0 = arith.constant 0 : index
    %c0_0 = arith.constant 0 : index
    %0 = vector.load %arg2[%c0, %c0_0] : memref<32x32xf32, #tpu.memory_space<vmem>>, vector<32x32xf32>
    %1 = tpu.iota {dimensions = array<i32: 0>} : vector<8x8xi32>
    %2 = tpu.iota {dimensions = array<i32: 1>} : vector<8x8xi32>
    %3 = tpu.iota {dimensions = array<i32: 1>} : vector<1x8xi32>
    %4 = arith.cmpi eq, %1, %2 : vector<8x8xi32>
    %5 = arith.extui %4 : vector<8x8xi1> to vector<8x8xi32>
    %6 = arith.sitofp %5 : vector<8x8xi32> to vector<8x8xf32>
    %c0_1 = arith.constant 0 : index
    %c0_2 = arith.constant 0 : index
    %c0_3 = arith.constant 0 : index
    %7 = vector.load %arg1[%c0_1, %c0_2, %c0_3] : memref<2x8x32xf32, #tpu.memory_space<vmem>>, vector<2x8x32xf32>
    %8 = vector.shape_cast %7 : vector<2x8x32xf32> to vector<16x32xf32>
    %cst = arith.constant dense<0.000000e+00> : vector<16x32xf32>
    %9 = tpu.matmul %8, %0, %cst {dimension_numbers = #tpu.dot_dimension_numbers<[1], [0], [0], [1], [0, 0, 1, 1], [], []>} : vector<16x32xf32>, vector<32x32xf32>, vector<16x32xf32> -> vector<16x32xf32>
    %cst_4 = arith.constant 0.000000e+00 : f32
    %10 = vector.broadcast %cst_4 : f32 to vector<16x32xf32>
    %11 = arith.maximumf %9, %10 : vector<16x32xf32>
    %12 = vector.shape_cast %11 : vector<16x32xf32> to vector<2x8x32xf32>
    %13 = vector.shape_cast %6 : vector<8x8xf32> to vector<1x8x8xf32>
    %14 = vector.shape_cast %13 : vector<1x8x8xf32> to vector<1x8x8xf32>
    %15 = vector.broadcast %14 : vector<1x8x8xf32> to vector<2x8x8xf32>
    %16 = vector.shape_cast %6 : vector<8x8xf32> to vector<1x8x8xf32>
    %17 = vector.shape_cast %16 : vector<1x8x8xf32> to vector<1x8x8xf32>
    %18 = vector.broadcast %17 : vector<1x8x8xf32> to vector<2x8x8xf32>
    %c0_5 = arith.constant 0 : index
    %c0_6 = arith.constant 0 : index
    %c0_7 = arith.constant 0 : index
    %19 = vector.load %arg3[%c0_5, %c0_6, %c0_7] : memref<2x8x8xf32, #tpu.memory_space<vmem>>, vector<2x8x8xf32>
    tpu.vector_store %arg3[%c0_5, %c0_6, %c0_7], %18 {strides = array<i32>} : memref<2x8x8xf32, #tpu.memory_space<vmem>>, vector<2x8x8xf32>,
    %20 = vector.extract_strided_slice %12 {offsets = [0, 1, 0], sizes = [2, 1, 32], strides = [1, 1, 1]} : vector<2x8x32xf32> to vector<2x1x32xf32>
    %21 = vector.shape_cast %20 : vector<2x1x32xf32> to vector<2x32xf32>
    %22 = vector.shape_cast %21 : vector<2x32xf32> to vector<2x1x32xf32>
    %23 = vector.broadcast %22 : vector<2x1x32xf32> to vector<2x8x32xf32>
    %24 = arith.mulf %12, %23 : vector<2x8x32xf32>
    %cst_8 = arith.constant dense<0.000000e+00> : vector<2x8xf32>
    %25 = vector.multi_reduction <add>, %24, %cst_8 [2] : vector<2x8x32xf32> to vector<2x8xf32>
    %c1_i32 = arith.constant 1 : i32
    %26 = vector.broadcast %c1_i32 : i32 to vector<1x8xi32>
    %27 = arith.cmpi slt, %3, %26 : vector<1x8xi32>
    %c1_i32_9 = arith.constant 1 : i32
    %28 = vector.broadcast %c1_i32_9 : i32 to vector<1x8xi32>
    %29 = arith.cmpi eq, %3, %28 : vector<1x8xi32>
    %30 = arith.extui %29 : vector<1x8xi1> to vector<1x8xi32>
    %31 = arith.sitofp %30 : vector<1x8xi32> to vector<1x8xf32>
    %32 = vector.shape_cast %27 : vector<1x8xi1> to vector<1x8xi1>
    %33 = vector.broadcast %32 : vector<1x8xi1> to vector<2x8xi1>
    %34 = vector.shape_cast %31 : vector<1x8xf32> to vector<1x8xf32>
    %35 = vector.broadcast %34 : vector<1x8xf32> to vector<2x8xf32>
    %36 = arith.select %33, %25, %35 : vector<2x8xi1>, vector<2x8xf32>
    %37 = vector.shape_cast %36 : vector<2x8xf32> to vector<2x1x8xf32>
    %c0_10 = arith.constant 0 : index
    %c1 = arith.constant 1 : index
    %c0_11 = arith.constant 0 : index
    %38 = vector.load %arg3[%c0_10, %c1, %c0_11] : memref<2x8x8xf32, #tpu.memory_space<vmem>>, vector<2x1x8xf32>
    tpu.vector_store %arg3[%c0_10, %c1, %c0_11], %37 {strides = array<i32>} : memref<2x8x8xf32, #tpu.memory_space<vmem>>, vector<2x1x8xf32>,
    %c1_i32_12 = arith.constant 1 : i32
    %39 = vector.broadcast %c1_i32_12 : i32 to vector<8x8xi32>
    %40 = arith.cmpi eq, %1, %39 : vector<8x8xi32>
    %c1_i32_13 = arith.constant 1 : i32
    %41 = vector.broadcast %c1_i32_13 : i32 to vector<8x8xi32>
    %42 = arith.cmpi slt, %2, %41 : vector<8x8xi32>
    %43 = arith.andi %40, %42 : vector<8x8xi1>
    %44 = vector.shape_cast %43 : vector<8x8xi1> to vector<1x8x8xi1>
    %c1_i32_14 = arith.constant 1 : i32
    %45 = vector.broadcast %c1_i32_14 : i32 to vector<8x8xi32>
    %46 = arith.cmpi eq, %2, %45 : vector<8x8xi32>
    %c1_i32_15 = arith.constant 1 : i32
    %47 = vector.broadcast %c1_i32_15 : i32 to vector<8x8xi32>
    %48 = arith.cmpi slt, %1, %47 : vector<8x8xi32>
    %49 = arith.andi %46, %48 : vector<8x8xi1>
    %50 = vector.shape_cast %49 : vector<8x8xi1> to vector<1x8x8xi1>
    %51 = vector.shape_cast %25 : vector<2x8xf32> to vector<2x1x8xf32>
    %52 = vector.shape_cast %44 : vector<1x8x8xi1> to vector<1x8x8xi1>
    %53 = vector.broadcast %52 : vector<1x8x8xi1> to vector<2x8x8xi1>
    %54 = vector.shape_cast %51 : vector<2x1x8xf32> to vector<2x1x8xf32>
    %55 = vector.broadcast %54 : vector<2x1x8xf32> to vector<2x8x8xf32>
    %56 = arith.select %53, %55, %15 : vector<2x8x8xi1>, vector<2x8x8xf32>
    %57 = vector.shape_cast %25 : vector<2x8xf32> to vector<2x8x1xf32>
    %58 = vector.shape_cast %50 : vector<1x8x8xi1> to vector<1x8x8xi1>
    %59 = vector.broadcast %58 : vector<1x8x8xi1> to vector<2x8x8xi1>
    %60 = vector.shape_cast %57 : vector<2x8x1xf32> to vector<2x8x1xf32>
    %61 = vector.broadcast %60 : vector<2x8x1xf32> to vector<2x8x8xf32>
    %62 = arith.select %59, %61, %56 : vector<2x8x8xi1>, vector<2x8x8xf32>
    %cst_16 = arith.constant dense<0.000000e+00> : vector<2x8xf32>
    %63 = vector.multi_reduction <add>, %62, %cst_16 [2] : vector<2x8x8xf32> to vector<2x8xf32>
    %64 = vector.shape_cast %63 : vector<2x8xf32> to vector<2x8x1xf32>
    %65 = math.rsqrt %64 : vector<2x8x1xf32>
    %cst_17 = arith.constant dense<0.000000e+00> : vector<2x8xf32>
    %66 = vector.multi_reduction <add>, %62, %cst_17 [1] : vector<2x8x8xf32> to vector<2x8xf32>
    %67 = vector.shape_cast %66 : vector<2x8xf32> to vector<2x1x8xf32>
    %68 = math.rsqrt %67 : vector<2x1x8xf32>
    %69 = vector.broadcast %65 : vector<2x8x1xf32> to vector<2x8x8xf32>
    %70 = arith.mulf %62, %69 : vector<2x8x8xf32>
    %71 = vector.broadcast %68 : vector<2x1x8xf32> to vector<2x8x8xf32>
    %72 = arith.mulf %70, %71 : vector<2x8x8xf32>
    "tpu.trace_start"() <{level = 10 : i32, message = "bij,bjh->bih"}> : () -> ()
    %cst_18 = arith.constant dense<0.000000e+00> : vector<2x8x32xf32>
    %73 = tpu.matmul %72, %12, %cst_18 {dimension_numbers = #tpu.dot_dimension_numbers<[2], [1], [1], [2], [0, 0, 0, 1, 1, 2], [0], [0]>} : vector<2x8x8xf32>, vector<2x8x32xf32>, vector<2x8x32xf32> -> vector<2x8x32xf32>
    "tpu.trace_stop"() : () -> ()
    %74 = vector.shape_cast %73 : vector<2x8x32xf32> to vector<16x32xf32>
    %cst_19 = arith.constant dense<0.000000e+00> : vector<16x32xf32>
    %75 = tpu.matmul %74, %0, %cst_19 {dimension_numbers = #tpu.dot_dimension_numbers<[1], [0], [0], [1], [0, 0, 1, 1], [], []>} : vector<16x32xf32>, vector<32x32xf32>, vector<16x32xf32> -> vector<16x32xf32>
    %cst_20 = arith.constant 0.000000e+00 : f32
    %76 = vector.broadcast %cst_20 : f32 to vector<16x32xf32>
    %77 = arith.maximumf %75, %76 : vector<16x32xf32>
    %78 = vector.shape_cast %77 : vector<16x32xf32> to vector<2x8x32xf32>
    %79 = vector.extract_strided_slice %78 {offsets = [0, 2, 0], sizes = [2, 1, 32], strides = [1, 1, 1]} : vector<2x8x32xf32> to vector<2x1x32xf32>
    %80 = vector.shape_cast %79 : vector<2x1x32xf32> to vector<2x32xf32>
    %81 = vector.shape_cast %80 : vector<2x32xf32> to vector<2x1x32xf32>
    %82 = vector.broadcast %81 : vector<2x1x32xf32> to vector<2x8x32xf32>
    %83 = arith.mulf %78, %82 : vector<2x8x32xf32>
    %cst_21 = arith.constant dense<0.000000e+00> : vector<2x8xf32>
    %84 = vector.multi_reduction <add>, %83, %cst_21 [2] : vector<2x8x32xf32> to vector<2x8xf32>
    %c2_i32 = arith.constant 2 : i32
    %85 = vector.broadcast %c2_i32 : i32 to vector<1x8xi32>
    %86 = arith.cmpi slt, %3, %85 : vector<1x8xi32>
    %c2_i32_22 = arith.constant 2 : i32
    %87 = vector.broadcast %c2_i32_22 : i32 to vector<1x8xi32>
    %88 = arith.cmpi eq, %3, %87 : vector<1x8xi32>
    %89 = arith.extui %88 : vector<1x8xi1> to vector<1x8xi32>
    %90 = arith.sitofp %89 : vector<1x8xi32> to vector<1x8xf32>
    %91 = vector.shape_cast %86 : vector<1x8xi1> to vector<1x8xi1>
    %92 = vector.broadcast %91 : vector<1x8xi1> to vector<2x8xi1>
    %93 = vector.shape_cast %90 : vector<1x8xf32> to vector<1x8xf32>
    %94 = vector.broadcast %93 : vector<1x8xf32> to vector<2x8xf32>
    %95 = arith.select %92, %84, %94 : vector<2x8xi1>, vector<2x8xf32>
    %96 = vector.shape_cast %95 : vector<2x8xf32> to vector<2x1x8xf32>
    %c0_23 = arith.constant 0 : index
    %c2 = arith.constant 2 : index
    %c0_24 = arith.constant 0 : index
    %97 = vector.load %arg3[%c0_23, %c2, %c0_24] : memref<2x8x8xf32, #tpu.memory_space<vmem>>, vector<2x1x8xf32>
    tpu.vector_store %arg3[%c0_23, %c2, %c0_24], %96 {strides = array<i32>} : memref<2x8x8xf32, #tpu.memory_space<vmem>>, vector<2x1x8xf32>,
    %c2_i32_25 = arith.constant 2 : i32
    %98 = vector.broadcast %c2_i32_25 : i32 to vector<8x8xi32>
    %99 = arith.cmpi eq, %1, %98 : vector<8x8xi32>
    %c2_i32_26 = arith.constant 2 : i32
    %100 = vector.broadcast %c2_i32_26 : i32 to vector<8x8xi32>
    %101 = arith.cmpi slt, %2, %100 : vector<8x8xi32>
    %102 = arith.andi %99, %101 : vector<8x8xi1>
    %103 = vector.shape_cast %102 : vector<8x8xi1> to vector<1x8x8xi1>
    %c2_i32_27 = arith.constant 2 : i32
    %104 = vector.broadcast %c2_i32_27 : i32 to vector<8x8xi32>
    %105 = arith.cmpi eq, %2, %104 : vector<8x8xi32>
    %c2_i32_28 = arith.constant 2 : i32
    %106 = vector.broadcast %c2_i32_28 : i32 to vector<8x8xi32>
    %107 = arith.cmpi slt, %1, %106 : vector<8x8xi32>
    %108 = arith.andi %105, %107 : vector<8x8xi1>
    %109 = vector.shape_cast %108 : vector<8x8xi1> to vector<1x8x8xi1>
    %110 = vector.shape_cast %84 : vector<2x8xf32> to vector<2x1x8xf32>
    %111 = vector.shape_cast %103 : vector<1x8x8xi1> to vector<1x8x8xi1>
    %112 = vector.broadcast %111 : vector<1x8x8xi1> to vector<2x8x8xi1>
    %113 = vector.shape_cast %110 : vector<2x1x8xf32> to vector<2x1x8xf32>
    %114 = vector.broadcast %113 : vector<2x1x8xf32> to vector<2x8x8xf32>
    %115 = arith.select %112, %114, %72 : vector<2x8x8xi1>, vector<2x8x8xf32>
    %116 = vector.shape_cast %84 : vector<2x8xf32> to vector<2x8x1xf32>
    %117 = vector.shape_cast %109 : vector<1x8x8xi1> to vector<1x8x8xi1>
    %118 = vector.broadcast %117 : vector<1x8x8xi1> to vector<2x8x8xi1>
    %119 = vector.shape_cast %116 : vector<2x8x1xf32> to vector<2x8x1xf32>
    %120 = vector.broadcast %119 : vector<2x8x1xf32> to vector<2x8x8xf32>
    %121 = arith.select %118, %120, %115 : vector<2x8x8xi1>, vector<2x8x8xf32>
    %cst_29 = arith.constant dense<0.000000e+00> : vector<2x8xf32>
    %122 = vector.multi_reduction <add>, %121, %cst_29 [2] : vector<2x8x8xf32> to vector<2x8xf32>
    %123 = vector.shape_cast %122 : vector<2x8xf32> to vector<2x8x1xf32>
    %124 = math.rsqrt %123 : vector<2x8x1xf32>
    %cst_30 = arith.constant dense<0.000000e+00> : vector<2x8xf32>
    %125 = vector.multi_reduction <add>, %121, %cst_30 [1] : vector<2x8x8xf32> to vector<2x8xf32>
    %126 = vector.shape_cast %125 : vector<2x8xf32> to vector<2x1x8xf32>
    %127 = math.rsqrt %126 : vector<2x1x8xf32>
    %128 = vector.broadcast %124 : vector<2x8x1xf32> to vector<2x8x8xf32>
    %129 = arith.mulf %121, %128 : vector<2x8x8xf32>
    %130 = vector.broadcast %127 : vector<2x1x8xf32> to vector<2x8x8xf32>
    %131 = arith.mulf %129, %130 : vector<2x8x8xf32>
    "tpu.trace_start"() <{level = 10 : i32, message = "bij,bjh->bih"}> : () -> ()
    %cst_31 = arith.constant dense<0.000000e+00> : vector<2x8x32xf32>
    %132 = tpu.matmul %131, %78, %cst_31 {dimension_numbers = #tpu.dot_dimension_numbers<[2], [1], [1], [2], [0, 0, 0, 1, 1, 2], [0], [0]>} : vector<2x8x8xf32>, vector<2x8x32xf32>, vector<2x8x32xf32> -> vector<2x8x32xf32>
    "tpu.trace_stop"() : () -> ()
    %133 = vector.shape_cast %132 : vector<2x8x32xf32> to vector<16x32xf32>
    %cst_32 = arith.constant dense<0.000000e+00> : vector<16x32xf32>
    %134 = tpu.matmul %133, %0, %cst_32 {dimension_numbers = #tpu.dot_dimension_numbers<[1], [0], [0], [1], [0, 0, 1, 1], [], []>} : vector<16x32xf32>, vector<32x32xf32>, vector<16x32xf32> -> vector<16x32xf32>
    %cst_33 = arith.constant 0.000000e+00 : f32
    %135 = vector.broadcast %cst_33 : f32 to vector<16x32xf32>
    %136 = arith.maximumf %134, %135 : vector<16x32xf32>
    %137 = vector.shape_cast %136 : vector<16x32xf32> to vector<2x8x32xf32>
    %138 = vector.extract_strided_slice %137 {offsets = [0, 3, 0], sizes = [2, 1, 32], strides = [1, 1, 1]} : vector<2x8x32xf32> to vector<2x1x32xf32>
    %139 = vector.shape_cast %138 : vector<2x1x32xf32> to vector<2x32xf32>
    %140 = vector.shape_cast %139 : vector<2x32xf32> to vector<2x1x32xf32>
    %141 = vector.broadcast %140 : vector<2x1x32xf32> to vector<2x8x32xf32>
    %142 = arith.mulf %137, %141 : vector<2x8x32xf32>
    %cst_34 = arith.constant dense<0.000000e+00> : vector<2x8xf32>
    %143 = vector.multi_reduction <add>, %142, %cst_34 [2] : vector<2x8x32xf32> to vector<2x8xf32>
    %c3_i32 = arith.constant 3 : i32
    %144 = vector.broadcast %c3_i32 : i32 to vector<1x8xi32>
    %145 = arith.cmpi slt, %3, %144 : vector<1x8xi32>
    %c3_i32_35 = arith.constant 3 : i32
    %146 = vector.broadcast %c3_i32_35 : i32 to vector<1x8xi32>
    %147 = arith.cmpi eq, %3, %146 : vector<1x8xi32>
    %148 = arith.extui %147 : vector<1x8xi1> to vector<1x8xi32>
    %149 = arith.sitofp %148 : vector<1x8xi32> to vector<1x8xf32>
    %150 = vector.shape_cast %145 : vector<1x8xi1> to vector<1x8xi1>
    %151 = vector.broadcast %150 : vector<1x8xi1> to vector<2x8xi1>
    %152 = vector.shape_cast %149 : vector<1x8xf32> to vector<1x8xf32>
    %153 = vector.broadcast %152 : vector<1x8xf32> to vector<2x8xf32>
    %154 = arith.select %151, %143, %153 : vector<2x8xi1>, vector<2x8xf32>
    %155 = vector.shape_cast %154 : vector<2x8xf32> to vector<2x1x8xf32>
    %c0_36 = arith.constant 0 : index
    %c3 = arith.constant 3 : index
    %c0_37 = arith.constant 0 : index
    %156 = vector.load %arg3[%c0_36, %c3, %c0_37] : memref<2x8x8xf32, #tpu.memory_space<vmem>>, vector<2x1x8xf32>
    tpu.vector_store %arg3[%c0_36, %c3, %c0_37], %155 {strides = array<i32>} : memref<2x8x8xf32, #tpu.memory_space<vmem>>, vector<2x1x8xf32>,
    %c3_i32_38 = arith.constant 3 : i32
    %157 = vector.broadcast %c3_i32_38 : i32 to vector<8x8xi32>
    %158 = arith.cmpi eq, %1, %157 : vector<8x8xi32>
    %c3_i32_39 = arith.constant 3 : i32
    %159 = vector.broadcast %c3_i32_39 : i32 to vector<8x8xi32>
    %160 = arith.cmpi slt, %2, %159 : vector<8x8xi32>
    %161 = arith.andi %158, %160 : vector<8x8xi1>
    %162 = vector.shape_cast %161 : vector<8x8xi1> to vector<1x8x8xi1>
    %c3_i32_40 = arith.constant 3 : i32
    %163 = vector.broadcast %c3_i32_40 : i32 to vector<8x8xi32>
    %164 = arith.cmpi eq, %2, %163 : vector<8x8xi32>
    %c3_i32_41 = arith.constant 3 : i32
    %165 = vector.broadcast %c3_i32_41 : i32 to vector<8x8xi32>
    %166 = arith.cmpi slt, %1, %165 : vector<8x8xi32>
    %167 = arith.andi %164, %166 : vector<8x8xi1>
    %168 = vector.shape_cast %167 : vector<8x8xi1> to vector<1x8x8xi1>
    %169 = vector.shape_cast %143 : vector<2x8xf32> to vector<2x1x8xf32>
    %170 = vector.shape_cast %162 : vector<1x8x8xi1> to vector<1x8x8xi1>
    %171 = vector.broadcast %170 : vector<1x8x8xi1> to vector<2x8x8xi1>
    %172 = vector.shape_cast %169 : vector<2x1x8xf32> to vector<2x1x8xf32>
    %173 = vector.broadcast %172 : vector<2x1x8xf32> to vector<2x8x8xf32>
    %174 = arith.select %171, %173, %131 : vector<2x8x8xi1>, vector<2x8x8xf32>
    %175 = vector.shape_cast %143 : vector<2x8xf32> to vector<2x8x1xf32>
    %176 = vector.shape_cast %168 : vector<1x8x8xi1> to vector<1x8x8xi1>
    %177 = vector.broadcast %176 : vector<1x8x8xi1> to vector<2x8x8xi1>
    %178 = vector.shape_cast %175 : vector<2x8x1xf32> to vector<2x8x1xf32>
    %179 = vector.broadcast %178 : vector<2x8x1xf32> to vector<2x8x8xf32>
    %180 = arith.select %177, %179, %174 : vector<2x8x8xi1>, vector<2x8x8xf32>
    %cst_42 = arith.constant dense<0.000000e+00> : vector<2x8xf32>
    %181 = vector.multi_reduction <add>, %180, %cst_42 [2] : vector<2x8x8xf32> to vector<2x8xf32>
    %182 = vector.shape_cast %181 : vector<2x8xf32> to vector<2x8x1xf32>
    %183 = math.rsqrt %182 : vector<2x8x1xf32>
    %cst_43 = arith.constant dense<0.000000e+00> : vector<2x8xf32>
    %184 = vector.multi_reduction <add>, %180, %cst_43 [1] : vector<2x8x8xf32> to vector<2x8xf32>
    %185 = vector.shape_cast %184 : vector<2x8xf32> to vector<2x1x8xf32>
    %186 = math.rsqrt %185 : vector<2x1x8xf32>
    %187 = vector.broadcast %183 : vector<2x8x1xf32> to vector<2x8x8xf32>
    %188 = arith.mulf %180, %187 : vector<2x8x8xf32>
    %189 = vector.broadcast %186 : vector<2x1x8xf32> to vector<2x8x8xf32>
    %190 = arith.mulf %188, %189 : vector<2x8x8xf32>
    "tpu.trace_start"() <{level = 10 : i32, message = "bij,bjh->bih"}> : () -> ()
    %cst_44 = arith.constant dense<0.000000e+00> : vector<2x8x32xf32>
    %191 = tpu.matmul %190, %137, %cst_44 {dimension_numbers = #tpu.dot_dimension_numbers<[2], [1], [1], [2], [0, 0, 0, 1, 1, 2], [0], [0]>} : vector<2x8x8xf32>, vector<2x8x32xf32>, vector<2x8x32xf32> -> vector<2x8x32xf32>
    "tpu.trace_stop"() : () -> ()
    %192 = vector.shape_cast %191 : vector<2x8x32xf32> to vector<16x32xf32>
    %cst_45 = arith.constant dense<0.000000e+00> : vector<16x32xf32>
    %193 = tpu.matmul %192, %0, %cst_45 {dimension_numbers = #tpu.dot_dimension_numbers<[1], [0], [0], [1], [0, 0, 1, 1], [], []>} : vector<16x32xf32>, vector<32x32xf32>, vector<16x32xf32> -> vector<16x32xf32>
    %cst_46 = arith.constant 0.000000e+00 : f32
    %194 = vector.broadcast %cst_46 : f32 to vector<16x32xf32>
    %195 = arith.maximumf %193, %194 : vector<16x32xf32>
    %196 = vector.shape_cast %195 : vector<16x32xf32> to vector<2x8x32xf32>
    %197 = vector.extract_strided_slice %196 {offsets = [0, 4, 0], sizes = [2, 1, 32], strides = [1, 1, 1]} : vector<2x8x32xf32> to vector<2x1x32xf32>
    %198 = vector.shape_cast %197 : vector<2x1x32xf32> to vector<2x32xf32>
    %199 = vector.shape_cast %198 : vector<2x32xf32> to vector<2x1x32xf32>
    %200 = vector.broadcast %199 : vector<2x1x32xf32> to vector<2x8x32xf32>
    %201 = arith.mulf %196, %200 : vector<2x8x32xf32>
    %cst_47 = arith.constant dense<0.000000e+00> : vector<2x8xf32>
    %202 = vector.multi_reduction <add>, %201, %cst_47 [2] : vector<2x8x32xf32> to vector<2x8xf32>
    %c4_i32 = arith.constant 4 : i32
    %203 = vector.broadcast %c4_i32 : i32 to vector<1x8xi32>
    %204 = arith.cmpi slt, %3, %203 : vector<1x8xi32>
    %c4_i32_48 = arith.constant 4 : i32
    %205 = vector.broadcast %c4_i32_48 : i32 to vector<1x8xi32>
    %206 = arith.cmpi eq, %3, %205 : vector<1x8xi32>
    %207 = arith.extui %206 : vector<1x8xi1> to vector<1x8xi32>
    %208 = arith.sitofp %207 : vector<1x8xi32> to vector<1x8xf32>
    %209 = vector.shape_cast %204 : vector<1x8xi1> to vector<1x8xi1>
    %210 = vector.broadcast %209 : vector<1x8xi1> to vector<2x8xi1>
    %211 = vector.shape_cast %208 : vector<1x8xf32> to vector<1x8xf32>
    %212 = vector.broadcast %211 : vector<1x8xf32> to vector<2x8xf32>
    %213 = arith.select %210, %202, %212 : vector<2x8xi1>, vector<2x8xf32>
    %214 = vector.shape_cast %213 : vector<2x8xf32> to vector<2x1x8xf32>
    %c0_49 = arith.constant 0 : index
    %c4 = arith.constant 4 : index
    %c0_50 = arith.constant 0 : index
    %215 = vector.load %arg3[%c0_49, %c4, %c0_50] : memref<2x8x8xf32, #tpu.memory_space<vmem>>, vector<2x1x8xf32>
    tpu.vector_store %arg3[%c0_49, %c4, %c0_50], %214 {strides = array<i32>} : memref<2x8x8xf32, #tpu.memory_space<vmem>>, vector<2x1x8xf32>,
    %c4_i32_51 = arith.constant 4 : i32
    %216 = vector.broadcast %c4_i32_51 : i32 to vector<8x8xi32>
    %217 = arith.cmpi eq, %1, %216 : vector<8x8xi32>
    %c4_i32_52 = arith.constant 4 : i32
    %218 = vector.broadcast %c4_i32_52 : i32 to vector<8x8xi32>
    %219 = arith.cmpi slt, %2, %218 : vector<8x8xi32>
    %220 = arith.andi %217, %219 : vector<8x8xi1>
    %221 = vector.shape_cast %220 : vector<8x8xi1> to vector<1x8x8xi1>
    %c4_i32_53 = arith.constant 4 : i32
    %222 = vector.broadcast %c4_i32_53 : i32 to vector<8x8xi32>
    %223 = arith.cmpi eq, %2, %222 : vector<8x8xi32>
    %c4_i32_54 = arith.constant 4 : i32
    %224 = vector.broadcast %c4_i32_54 : i32 to vector<8x8xi32>
    %225 = arith.cmpi slt, %1, %224 : vector<8x8xi32>
    %226 = arith.andi %223, %225 : vector<8x8xi1>
    %227 = vector.shape_cast %226 : vector<8x8xi1> to vector<1x8x8xi1>
    %228 = vector.shape_cast %202 : vector<2x8xf32> to vector<2x1x8xf32>
    %229 = vector.shape_cast %221 : vector<1x8x8xi1> to vector<1x8x8xi1>
    %230 = vector.broadcast %229 : vector<1x8x8xi1> to vector<2x8x8xi1>
    %231 = vector.shape_cast %228 : vector<2x1x8xf32> to vector<2x1x8xf32>
    %232 = vector.broadcast %231 : vector<2x1x8xf32> to vector<2x8x8xf32>
    %233 = arith.select %230, %232, %190 : vector<2x8x8xi1>, vector<2x8x8xf32>
    %234 = vector.shape_cast %202 : vector<2x8xf32> to vector<2x8x1xf32>
    %235 = vector.shape_cast %227 : vector<1x8x8xi1> to vector<1x8x8xi1>
    %236 = vector.broadcast %235 : vector<1x8x8xi1> to vector<2x8x8xi1>
    %237 = vector.shape_cast %234 : vector<2x8x1xf32> to vector<2x8x1xf32>
    %238 = vector.broadcast %237 : vector<2x8x1xf32> to vector<2x8x8xf32>
    %239 = arith.select %236, %238, %233 : vector<2x8x8xi1>, vector<2x8x8xf32>
    %cst_55 = arith.constant dense<0.000000e+00> : vector<2x8xf32>
    %240 = vector.multi_reduction <add>, %239, %cst_55 [2] : vector<2x8x8xf32> to vector<2x8xf32>
    %241 = vector.shape_cast %240 : vector<2x8xf32> to vector<2x8x1xf32>
    %242 = math.rsqrt %241 : vector<2x8x1xf32>
    %cst_56 = arith.constant dense<0.000000e+00> : vector<2x8xf32>
    %243 = vector.multi_reduction <add>, %239, %cst_56 [1] : vector<2x8x8xf32> to vector<2x8xf32>
    %244 = vector.shape_cast %243 : vector<2x8xf32> to vector<2x1x8xf32>
    %245 = math.rsqrt %244 : vector<2x1x8xf32>
    %246 = vector.broadcast %242 : vector<2x8x1xf32> to vector<2x8x8xf32>
    %247 = arith.mulf %239, %246 : vector<2x8x8xf32>
    %248 = vector.broadcast %245 : vector<2x1x8xf32> to vector<2x8x8xf32>
    %249 = arith.mulf %247, %248 : vector<2x8x8xf32>
    "tpu.trace_start"() <{level = 10 : i32, message = "bij,bjh->bih"}> : () -> ()
    %cst_57 = arith.constant dense<0.000000e+00> : vector<2x8x32xf32>
    %250 = tpu.matmul %249, %196, %cst_57 {dimension_numbers = #tpu.dot_dimension_numbers<[2], [1], [1], [2], [0, 0, 0, 1, 1, 2], [0], [0]>} : vector<2x8x8xf32>, vector<2x8x32xf32>, vector<2x8x32xf32> -> vector<2x8x32xf32>
    "tpu.trace_stop"() : () -> ()
    %251 = vector.shape_cast %250 : vector<2x8x32xf32> to vector<16x32xf32>
    %cst_58 = arith.constant dense<0.000000e+00> : vector<16x32xf32>
    %252 = tpu.matmul %251, %0, %cst_58 {dimension_numbers = #tpu.dot_dimension_numbers<[1], [0], [0], [1], [0, 0, 1, 1], [], []>} : vector<16x32xf32>, vector<32x32xf32>, vector<16x32xf32> -> vector<16x32xf32>
    %cst_59 = arith.constant 0.000000e+00 : f32
    %253 = vector.broadcast %cst_59 : f32 to vector<16x32xf32>
    %254 = arith.maximumf %252, %253 : vector<16x32xf32>
    %255 = vector.shape_cast %254 : vector<16x32xf32> to vector<2x8x32xf32>
    %256 = vector.extract_strided_slice %255 {offsets = [0, 5, 0], sizes = [2, 1, 32], strides = [1, 1, 1]} : vector<2x8x32xf32> to vector<2x1x32xf32>
    %257 = vector.shape_cast %256 : vector<2x1x32xf32> to vector<2x32xf32>
    %258 = vector.shape_cast %257 : vector<2x32xf32> to vector<2x1x32xf32>
    %259 = vector.broadcast %258 : vector<2x1x32xf32> to vector<2x8x32xf32>
    %260 = arith.mulf %255, %259 : vector<2x8x32xf32>
    %cst_60 = arith.constant dense<0.000000e+00> : vector<2x8xf32>
    %261 = vector.multi_reduction <add>, %260, %cst_60 [2] : vector<2x8x32xf32> to vector<2x8xf32>
    %c5_i32 = arith.constant 5 : i32
    %262 = vector.broadcast %c5_i32 : i32 to vector<1x8xi32>
    %263 = arith.cmpi slt, %3, %262 : vector<1x8xi32>
    %c5_i32_61 = arith.constant 5 : i32
    %264 = vector.broadcast %c5_i32_61 : i32 to vector<1x8xi32>
    %265 = arith.cmpi eq, %3, %264 : vector<1x8xi32>
    %266 = arith.extui %265 : vector<1x8xi1> to vector<1x8xi32>
    %267 = arith.sitofp %266 : vector<1x8xi32> to vector<1x8xf32>
    %268 = vector.shape_cast %263 : vector<1x8xi1> to vector<1x8xi1>
    %269 = vector.broadcast %268 : vector<1x8xi1> to vector<2x8xi1>
    %270 = vector.shape_cast %267 : vector<1x8xf32> to vector<1x8xf32>
    %271 = vector.broadcast %270 : vector<1x8xf32> to vector<2x8xf32>
    %272 = arith.select %269, %261, %271 : vector<2x8xi1>, vector<2x8xf32>
    %273 = vector.shape_cast %272 : vector<2x8xf32> to vector<2x1x8xf32>
    %c0_62 = arith.constant 0 : index
    %c5 = arith.constant 5 : index
    %c0_63 = arith.constant 0 : index
    %274 = vector.load %arg3[%c0_62, %c5, %c0_63] : memref<2x8x8xf32, #tpu.memory_space<vmem>>, vector<2x1x8xf32>
    tpu.vector_store %arg3[%c0_62, %c5, %c0_63], %273 {strides = array<i32>} : memref<2x8x8xf32, #tpu.memory_space<vmem>>, vector<2x1x8xf32>,
    %c5_i32_64 = arith.constant 5 : i32
    %275 = vector.broadcast %c5_i32_64 : i32 to vector<8x8xi32>
    %276 = arith.cmpi eq, %1, %275 : vector<8x8xi32>
    %c5_i32_65 = arith.constant 5 : i32
    %277 = vector.broadcast %c5_i32_65 : i32 to vector<8x8xi32>
    %278 = arith.cmpi slt, %2, %277 : vector<8x8xi32>
    %279 = arith.andi %276, %278 : vector<8x8xi1>
    %280 = vector.shape_cast %279 : vector<8x8xi1> to vector<1x8x8xi1>
    %c5_i32_66 = arith.constant 5 : i32
    %281 = vector.broadcast %c5_i32_66 : i32 to vector<8x8xi32>
    %282 = arith.cmpi eq, %2, %281 : vector<8x8xi32>
    %c5_i32_67 = arith.constant 5 : i32
    %283 = vector.broadcast %c5_i32_67 : i32 to vector<8x8xi32>
    %284 = arith.cmpi slt, %1, %283 : vector<8x8xi32>
    %285 = arith.andi %282, %284 : vector<8x8xi1>
    %286 = vector.shape_cast %285 : vector<8x8xi1> to vector<1x8x8xi1>
    %287 = vector.shape_cast %261 : vector<2x8xf32> to vector<2x1x8xf32>
    %288 = vector.shape_cast %280 : vector<1x8x8xi1> to vector<1x8x8xi1>
    %289 = vector.broadcast %288 : vector<1x8x8xi1> to vector<2x8x8xi1>
    %290 = vector.shape_cast %287 : vector<2x1x8xf32> to vector<2x1x8xf32>
    %291 = vector.broadcast %290 : vector<2x1x8xf32> to vector<2x8x8xf32>
    %292 = arith.select %289, %291, %249 : vector<2x8x8xi1>, vector<2x8x8xf32>
    %293 = vector.shape_cast %261 : vector<2x8xf32> to vector<2x8x1xf32>
    %294 = vector.shape_cast %286 : vector<1x8x8xi1> to vector<1x8x8xi1>
    %295 = vector.broadcast %294 : vector<1x8x8xi1> to vector<2x8x8xi1>
    %296 = vector.shape_cast %293 : vector<2x8x1xf32> to vector<2x8x1xf32>
    %297 = vector.broadcast %296 : vector<2x8x1xf32> to vector<2x8x8xf32>
    %298 = arith.select %295, %297, %292 : vector<2x8x8xi1>, vector<2x8x8xf32>
    %cst_68 = arith.constant dense<0.000000e+00> : vector<2x8xf32>
    %299 = vector.multi_reduction <add>, %298, %cst_68 [2] : vector<2x8x8xf32> to vector<2x8xf32>
    %300 = vector.shape_cast %299 : vector<2x8xf32> to vector<2x8x1xf32>
    %301 = math.rsqrt %300 : vector<2x8x1xf32>
    %cst_69 = arith.constant dense<0.000000e+00> : vector<2x8xf32>
    %302 = vector.multi_reduction <add>, %298, %cst_69 [1] : vector<2x8x8xf32> to vector<2x8xf32>
    %303 = vector.shape_cast %302 : vector<2x8xf32> to vector<2x1x8xf32>
    %304 = math.rsqrt %303 : vector<2x1x8xf32>
    %305 = vector.broadcast %301 : vector<2x8x1xf32> to vector<2x8x8xf32>
    %306 = arith.mulf %298, %305 : vector<2x8x8xf32>
    %307 = vector.broadcast %304 : vector<2x1x8xf32> to vector<2x8x8xf32>
    %308 = arith.mulf %306, %307 : vector<2x8x8xf32>
    "tpu.trace_start"() <{level = 10 : i32, message = "bij,bjh->bih"}> : () -> ()
    %cst_70 = arith.constant dense<0.000000e+00> : vector<2x8x32xf32>
    %309 = tpu.matmul %308, %255, %cst_70 {dimension_numbers = #tpu.dot_dimension_numbers<[2], [1], [1], [2], [0, 0, 0, 1, 1, 2], [0], [0]>} : vector<2x8x8xf32>, vector<2x8x32xf32>, vector<2x8x32xf32> -> vector<2x8x32xf32>
    "tpu.trace_stop"() : () -> ()
    %310 = vector.shape_cast %309 : vector<2x8x32xf32> to vector<16x32xf32>
    %cst_71 = arith.constant dense<0.000000e+00> : vector<16x32xf32>
    %311 = tpu.matmul %310, %0, %cst_71 {dimension_numbers = #tpu.dot_dimension_numbers<[1], [0], [0], [1], [0, 0, 1, 1], [], []>} : vector<16x32xf32>, vector<32x32xf32>, vector<16x32xf32> -> vector<16x32xf32>
    %cst_72 = arith.constant 0.000000e+00 : f32
    %312 = vector.broadcast %cst_72 : f32 to vector<16x32xf32>
    %313 = arith.maximumf %311, %312 : vector<16x32xf32>
    %314 = vector.shape_cast %313 : vector<16x32xf32> to vector<2x8x32xf32>
    %315 = vector.extract_strided_slice %314 {offsets = [0, 6, 0], sizes = [2, 1, 32], strides = [1, 1, 1]} : vector<2x8x32xf32> to vector<2x1x32xf32>
    %316 = vector.shape_cast %315 : vector<2x1x32xf32> to vector<2x32xf32>
    %317 = vector.shape_cast %316 : vector<2x32xf32> to vector<2x1x32xf32>
    %318 = vector.broadcast %317 : vector<2x1x32xf32> to vector<2x8x32xf32>
    %319 = arith.mulf %314, %318 : vector<2x8x32xf32>
    %cst_73 = arith.constant dense<0.000000e+00> : vector<2x8xf32>
    %320 = vector.multi_reduction <add>, %319, %cst_73 [2] : vector<2x8x32xf32> to vector<2x8xf32>
    %c6_i32 = arith.constant 6 : i32
    %321 = vector.broadcast %c6_i32 : i32 to vector<1x8xi32>
    %322 = arith.cmpi slt, %3, %321 : vector<1x8xi32>
    %c6_i32_74 = arith.constant 6 : i32
    %323 = vector.broadcast %c6_i32_74 : i32 to vector<1x8xi32>
    %324 = arith.cmpi eq, %3, %323 : vector<1x8xi32>
    %325 = arith.extui %324 : vector<1x8xi1> to vector<1x8xi32>
    %326 = arith.sitofp %325 : vector<1x8xi32> to vector<1x8xf32>
    %327 = vector.shape_cast %322 : vector<1x8xi1> to vector<1x8xi1>
    %328 = vector.broadcast %327 : vector<1x8xi1> to vector<2x8xi1>
    %329 = vector.shape_cast %326 : vector<1x8xf32> to vector<1x8xf32>
    %330 = vector.broadcast %329 : vector<1x8xf32> to vector<2x8xf32>
    %331 = arith.select %328, %320, %330 : vector<2x8xi1>, vector<2x8xf32>
    %332 = vector.shape_cast %331 : vector<2x8xf32> to vector<2x1x8xf32>
    %c0_75 = arith.constant 0 : index
    %c6 = arith.constant 6 : index
    %c0_76 = arith.constant 0 : index
    %333 = vector.load %arg3[%c0_75, %c6, %c0_76] : memref<2x8x8xf32, #tpu.memory_space<vmem>>, vector<2x1x8xf32>
    tpu.vector_store %arg3[%c0_75, %c6, %c0_76], %332 {strides = array<i32>} : memref<2x8x8xf32, #tpu.memory_space<vmem>>, vector<2x1x8xf32>,
    %c6_i32_77 = arith.constant 6 : i32
    %334 = vector.broadcast %c6_i32_77 : i32 to vector<8x8xi32>
    %335 = arith.cmpi eq, %1, %334 : vector<8x8xi32>
    %c6_i32_78 = arith.constant 6 : i32
    %336 = vector.broadcast %c6_i32_78 : i32 to vector<8x8xi32>
    %337 = arith.cmpi slt, %2, %336 : vector<8x8xi32>
    %338 = arith.andi %335, %337 : vector<8x8xi1>
    %339 = vector.shape_cast %338 : vector<8x8xi1> to vector<1x8x8xi1>
    %c6_i32_79 = arith.constant 6 : i32
    %340 = vector.broadcast %c6_i32_79 : i32 to vector<8x8xi32>
    %341 = arith.cmpi eq, %2, %340 : vector<8x8xi32>
    %c6_i32_80 = arith.constant 6 : i32
    %342 = vector.broadcast %c6_i32_80 : i32 to vector<8x8xi32>
    %343 = arith.cmpi slt, %1, %342 : vector<8x8xi32>
    %344 = arith.andi %341, %343 : vector<8x8xi1>
    %345 = vector.shape_cast %344 : vector<8x8xi1> to vector<1x8x8xi1>
    %346 = vector.shape_cast %320 : vector<2x8xf32> to vector<2x1x8xf32>
    %347 = vector.shape_cast %339 : vector<1x8x8xi1> to vector<1x8x8xi1>
    %348 = vector.broadcast %347 : vector<1x8x8xi1> to vector<2x8x8xi1>
    %349 = vector.shape_cast %346 : vector<2x1x8xf32> to vector<2x1x8xf32>
    %350 = vector.broadcast %349 : vector<2x1x8xf32> to vector<2x8x8xf32>
    %351 = arith.select %348, %350, %308 : vector<2x8x8xi1>, vector<2x8x8xf32>
    %352 = vector.shape_cast %320 : vector<2x8xf32> to vector<2x8x1xf32>
    %353 = vector.shape_cast %345 : vector<1x8x8xi1> to vector<1x8x8xi1>
    %354 = vector.broadcast %353 : vector<1x8x8xi1> to vector<2x8x8xi1>
    %355 = vector.shape_cast %352 : vector<2x8x1xf32> to vector<2x8x1xf32>
    %356 = vector.broadcast %355 : vector<2x8x1xf32> to vector<2x8x8xf32>
    %357 = arith.select %354, %356, %351 : vector<2x8x8xi1>, vector<2x8x8xf32>
    %cst_81 = arith.constant dense<0.000000e+00> : vector<2x8xf32>
    %358 = vector.multi_reduction <add>, %357, %cst_81 [2] : vector<2x8x8xf32> to vector<2x8xf32>
    %359 = vector.shape_cast %358 : vector<2x8xf32> to vector<2x8x1xf32>
    %360 = math.rsqrt %359 : vector<2x8x1xf32>
    %cst_82 = arith.constant dense<0.000000e+00> : vector<2x8xf32>
    %361 = vector.multi_reduction <add>, %357, %cst_82 [1] : vector<2x8x8xf32> to vector<2x8xf32>
    %362 = vector.shape_cast %361 : vector<2x8xf32> to vector<2x1x8xf32>
    %363 = math.rsqrt %362 : vector<2x1x8xf32>
    %364 = vector.broadcast %360 : vector<2x8x1xf32> to vector<2x8x8xf32>
    %365 = arith.mulf %357, %364 : vector<2x8x8xf32>
    %366 = vector.broadcast %363 : vector<2x1x8xf32> to vector<2x8x8xf32>
    %367 = arith.mulf %365, %366 : vector<2x8x8xf32>
    "tpu.trace_start"() <{level = 10 : i32, message = "bij,bjh->bih"}> : () -> ()
    %cst_83 = arith.constant dense<0.000000e+00> : vector<2x8x32xf32>
    %368 = tpu.matmul %367, %314, %cst_83 {dimension_numbers = #tpu.dot_dimension_numbers<[2], [1], [1], [2], [0, 0, 0, 1, 1, 2], [0], [0]>} : vector<2x8x8xf32>, vector<2x8x32xf32>, vector<2x8x32xf32> -> vector<2x8x32xf32>
    "tpu.trace_stop"() : () -> ()
    %369 = vector.shape_cast %368 : vector<2x8x32xf32> to vector<16x32xf32>
    %cst_84 = arith.constant dense<0.000000e+00> : vector<16x32xf32>
    %370 = tpu.matmul %369, %0, %cst_84 {dimension_numbers = #tpu.dot_dimension_numbers<[1], [0], [0], [1], [0, 0, 1, 1], [], []>} : vector<16x32xf32>, vector<32x32xf32>, vector<16x32xf32> -> vector<16x32xf32>
    %cst_85 = arith.constant 0.000000e+00 : f32
    %371 = vector.broadcast %cst_85 : f32 to vector<16x32xf32>
    %372 = arith.maximumf %370, %371 : vector<16x32xf32>
    %373 = vector.shape_cast %372 : vector<16x32xf32> to vector<2x8x32xf32>
    %374 = vector.extract_strided_slice %373 {offsets = [0, 7, 0], sizes = [2, 1, 32], strides = [1, 1, 1]} : vector<2x8x32xf32> to vector<2x1x32xf32>
    %375 = vector.shape_cast %374 : vector<2x1x32xf32> to vector<2x32xf32>
    %376 = vector.shape_cast %375 : vector<2x32xf32> to vector<2x1x32xf32>
    %377 = vector.broadcast %376 : vector<2x1x32xf32> to vector<2x8x32xf32>
    %378 = arith.mulf %373, %377 : vector<2x8x32xf32>
    %cst_86 = arith.constant dense<0.000000e+00> : vector<2x8xf32>
    %379 = vector.multi_reduction <add>, %378, %cst_86 [2] : vector<2x8x32xf32> to vector<2x8xf32>
    %c7_i32 = arith.constant 7 : i32
    %380 = vector.broadcast %c7_i32 : i32 to vector<1x8xi32>
    %381 = arith.cmpi slt, %3, %380 : vector<1x8xi32>
    %c7_i32_87 = arith.constant 7 : i32
    %382 = vector.broadcast %c7_i32_87 : i32 to vector<1x8xi32>
    %383 = arith.cmpi eq, %3, %382 : vector<1x8xi32>
    %384 = arith.extui %383 : vector<1x8xi1> to vector<1x8xi32>
    %385 = arith.sitofp %384 : vector<1x8xi32> to vector<1x8xf32>
    %386 = vector.shape_cast %381 : vector<1x8xi1> to vector<1x8xi1>
    %387 = vector.broadcast %386 : vector<1x8xi1> to vector<2x8xi1>
    %388 = vector.shape_cast %385 : vector<1x8xf32> to vector<1x8xf32>
    %389 = vector.broadcast %388 : vector<1x8xf32> to vector<2x8xf32>
    %390 = arith.select %387, %379, %389 : vector<2x8xi1>, vector<2x8xf32>
    %391 = vector.shape_cast %390 : vector<2x8xf32> to vector<2x1x8xf32>
    %c0_88 = arith.constant 0 : index
    %c7 = arith.constant 7 : index
    %c0_89 = arith.constant 0 : index
    %392 = vector.load %arg3[%c0_88, %c7, %c0_89] : memref<2x8x8xf32, #tpu.memory_space<vmem>>, vector<2x1x8xf32>
    tpu.vector_store %arg3[%c0_88, %c7, %c0_89], %391 {strides = array<i32>} : memref<2x8x8xf32, #tpu.memory_space<vmem>>, vector<2x1x8xf32>,
    %c0_90 = arith.constant 0 : index
    %c0_91 = arith.constant 0 : index
    %c0_92 = arith.constant 0 : index
    %393 = vector.load %arg3[%c0_90, %c0_91, %c0_92] : memref<2x8x8xf32, #tpu.memory_space<vmem>>, vector<2x8x8xf32>
    %394 = arith.cmpi sgt, %2, %1 : vector<8x8xi32>
    %395 = vector.shape_cast %394 : vector<8x8xi1> to vector<1x8x8xi1>
    %396 = tpu.transpose %393, [0, 2, 1] : vector<2x8x8xf32> -> vector<2x8x8xf32>
    %397 = vector.shape_cast %395 : vector<1x8x8xi1> to vector<1x8x8xi1>
    %398 = vector.broadcast %397 : vector<1x8x8xi1> to vector<2x8x8xi1>
    %399 = arith.select %398, %396, %393 : vector<2x8x8xi1>, vector<2x8x8xf32>
    %c0_93 = arith.constant 0 : index
    %c0_94 = arith.constant 0 : index
    %c0_95 = arith.constant 0 : index
    %400 = vector.load %arg3[%c0_93, %c0_94, %c0_95] : memref<2x8x8xf32, #tpu.memory_space<vmem>>, vector<2x8x8xf32>
    tpu.vector_store %arg3[%c0_93, %c0_94, %c0_95], %399 {strides = array<i32>} : memref<2x8x8xf32, #tpu.memory_space<vmem>>, vector<2x8x8xf32>,
    return
  }
  func.func @transform_0(%arg0: i32) -> (i32, i32, i32) {
    %c0_i32 = arith.constant 0 : i32
    %c0_i32_0 = arith.constant 0 : i32
    %c0_i32_1 = arith.constant 0 : i32
    return %arg0, %c0_i32, %c0_i32_0 : i32, i32, i32
  }
  func.func @transform_1(%arg0: i32) -> (i32, i32) {
    %c0_i32 = arith.constant 0 : i32
    %c0_i32_0 = arith.constant 0 : i32
    %c0_i32_1 = arith.constant 0 : i32
    return %c0_i32, %c0_i32_0 : i32, i32
  }
  func.func @transform_2(%arg0: i32) -> (i32, i32, i32) {
    %c0_i32 = arith.constant 0 : i32
    %c0_i32_0 = arith.constant 0 : i32
    %c0_i32_1 = arith.constant 0 : i32
    return %arg0, %c0_i32, %c0_i32_0 : i32, i32, i32
  }
}

</mosaic_0001>

<bundles_post_ra>
// kernel: tpu_custom_call.1
= control target key start
LH: loop header
LB: loop body
LE: loop exit
PB: predicated region body
PF: predicated region fallthrough
CT: control target
= control target key end

     0   :  { %7 = vsyncpa [#allocation3], 0  ;;  %s3121_s0 = inlined_call_operand.hbm [shape: f32[2,8,32], index: 0, kind: input, shape index: {}]   ;;  %s3122_s1 = inlined_call_operand.hbm [shape: f32[32,32], index: 1, kind: input, shape index: {}]   ;;  %s3123_s2 = inlined_call_operand.hbm [shape: f32[2,8,8], index: 2, kind: output, shape index: {}]  }
   0x1   :  { %8 = vsyncpa [#allocation6], 0 }
   0x2   :  { %9 = vsyncpa [#allocation4], 0  ;;  %s2780_s9 = smov [#allocation2]   ;;  %s2708_s13 = scalar_lea.hbm %s3121_s0, 256 }
   0x3   :  { %s15_s10 = sshll.u32 %s2780_s9, 4  ;;  %p2709_p0 = scmp.ne.s32.totalorder %s3121_s0, %s2708_s13  ;;  %s16_s10 = int_to_ptr.vmem [resolvable:$true] %s15_s10 }
   0x4   :  { %p2712_p1 = scmp.lt.u32.totalorder %s2708_s13, %s3121_s0 }
   0x6   :  { %p2714_p2 = pnand %p2712_p1, %p2709_p0 }
   0x8   :  { %2717 = shalt.err (!%p2714_p2)
}
   0x9   :  { %s2718_s18 = scalar_lea.vmem %s16_s10, 256  ;;  %p2723_p4 = scmp.lt.s32.totalorder %s16_s10, %s16_s10 }
   0xa   :  { %p2719_p3 = scmp.ne.s32.totalorder %s16_s10, %s2718_s18  ;;  %p2724_p5 = scmp.lt.s32.totalorder %s2718_s18, %s2718_s18 }
   0xc   :  { %p2725_p6 = por %p2724_p5, %p2723_p4 }
   0xe   :  { %p2726_p7 = pnand %p2725_p6, %p2719_p3 }
  0x10   :  { %2729 = shalt.err (!%p2726_p7)
}
  0x11   :  { %s2781_s19 = smov 128   ;;  %s2782_s20 = smov 8  }
  0x12   :  { %21 = dma.hbm_to_vmem [thread:$0]  %s3121_s0, 256, %s16_s10, [#allocation3], %s2781_s19, %s2781_s19, %s2782_s20  }
  0x13   :  { %s2783_s23 = smov [#allocation5]   ;;  %s2730_s27 = scalar_lea.hbm %s3122_s1, 512 }
  0x14   :  { %s27_s24 = sshll.u32 %s2783_s23, 4  ;;  %p2731_p8 = scmp.ne.s32.totalorder %s3122_s1, %s2730_s27  ;;  %s28_s24 = int_to_ptr.vmem [resolvable:$true] %s27_s24 }
  0x15   :  { %p2734_p9 = scmp.lt.u32.totalorder %s2730_s27, %s3122_s1 }
  0x17   :  { %p2736_p10 = pnand %p2734_p9, %p2731_p8 }
  0x19   :  { %2739 = shalt.err (!%p2736_p10)
}
  0x1a   :  { %s2740_s4 = scalar_lea.vmem %s28_s24, 512  ;;  %p2745_p12 = scmp.lt.s32.totalorder %s28_s24, %s28_s24 }
  0x1b   :  { %p2741_p11 = scmp.ne.s32.totalorder %s28_s24, %s2740_s4  ;;  %p2746_p13 = scmp.lt.s32.totalorder %s2740_s4, %s2740_s4 }
  0x1d   :  { %p2747_p0 = por %p2746_p13, %p2745_p12 }
  0x1f   :  { %p2748_p1 = pnand %p2747_p0, %p2741_p11 }
  0x21   :  { %2751 = shalt.err (!%p2748_p1)
}
  0x22   :  { %33 = dma.hbm_to_vmem [thread:$0]  %s3122_s1, 512, %s28_s24, [#allocation6], %s2781_s19, %s2781_s19, %s2782_s20  }
  0x23   :  { %2774 = dma.done.wait [#allocation3], 256  }
  0x24   :  { %2775 = vsyncadd [#allocation3], 4294967040 }
  0x25   :  { %2776 = dma.done.wait [#allocation6], 512  }
  0x26   :  { %2777 = vsyncadd [#allocation6], 4294966784  ;;  %vm53_vm0 = vcmask 261120   ;;  %v40_v0 = vld [vmem:[#allocation5] sm:$0xff]  ;;  %v41_v1 = vld [vmem:[#allocation5 + $0x8] sm:$0xff]  ;;  %v2784_v8 = vmov 0.0   ;;  %v44_v9 = vlaneseq }
  0x27   :  { %v42_v2 = vld [vmem:[#allocation5 + $0x10] sm:$0xff]  ;;  %v2833_v3 = vpack.c.bf16 %v41_v1, %v40_v0  ;;  %v43_v4 = vld [vmem:[#allocation5 + $0x18] sm:$0xff]  ;;  %2475 = vmatprep.subr.mxu1 %v2784_v8  ;;  %vm137_vm2 = vcmask 64512   ;;  %v2785_v25 = vmov 1966171168   ;;  %vm172_vm9 = vcmask 1041409  }
  0x28   :  { %v51_v5 = vld [vmem:[#allocation2] sm:$0xff]  ;;  %v2835_v6 = vpack.c.bf16 %v43_v4, %v42_v2  ;;  %v52_v7 = vld [vmem:[#allocation2 + $0x8] sm:$0xff]  ;;  %v2845_v10 = vshrl.u32 %v44_v9, 7  ;;  %v2847_v11 = vand.u32 127, %v44_v9  ;;  %v178_v26 = vunpack.c.l.s4 %v2785_v25  ;;  %s2787_s1 = smov [#allocation7]  }
  0x29   :  { %2467 = vmatprep.mubr.msk.f32.mxu0 %vm53_vm0, %v51_v5  ;;  %2597 = vmatprep.subr.bf16.mxu0 %v2833_v3  ;;  %vm201_vm10 = vcmask 57344   ;;  %vm2786_vm11 = vmmov 0   ;;  %s2346_s6 = sshll.u32 %s2787_s1, 4  ;;  %s2347_s6 = int_to_ptr.vmem [resolvable:$true] %s2346_s6 }
  0x2a   :  { %2599 = vmatpush3.bf16.msra.mxu0 %v2833_v3  ;;  %vm48_vm1 = vcmp.eq.s32.totalorder %v2845_v10, %v2847_v11  ;;  %v142_v14 = vsub.s32 1, %v2845_v10  ;;  %vm156_vm3 = vcmp.lt.s32.totalorder %v2847_v11, 1  ;;  %v2862_v24 = vsub.s32 %v2847_v11, %v2845_v10  ;;  %2477 = vmatprep.mubr.msk.f32.mxu1 %vm2786_vm11, %v2784_v8  ;;  %s2752_s7 = scalar_lea.vmem %s2347_s6, 256  ;;  %p2757_p3 = scmp.lt.s32.totalorder %s2347_s6, %s2347_s6 }
  0x2b   :  { %2601 = vmatprep.subr.bf16.mxu0 %v2835_v6  ;;  %v2359_v12 = vsel %vm48_vm1, 1.0, %v2784_v8  ;;  %vm204_vm4 = vcmp.eq.s32.totalorder %v2845_v10, 1  ;;  %vm157_vm5 = vcmp.eq.s32.totalorder %v2847_v11, 1  ;;  %vm206_vm6 = vcmp.lt.s32.totalorder %v2845_v10, 1  ;;  %p2753_p2 = scmp.ne.s32.totalorder %s2347_s6, %s2752_s7  ;;  %p2758_p4 = scmp.lt.s32.totalorder %s2752_s7, %s2752_s7 }
  0x2c   :  { %138 = vst.msk [vmem:[#allocation7] sm:$0xff] %vm137_vm2, %v2359_v12  ;;  %139 = vst.msk [vmem:[#allocation7 + $0x8] sm:$0xff] %vm137_vm2, %v2359_v12  ;;  %v179_v30 = vunpack.c.0.s8 %v178_v26  ;;  %v2362_v34 = vsel %vm157_vm5, 1.0, %v2784_v8  ;;  %vm507_vm12 = vcmp.lt.s32.totalorder %v2847_v11, 2  ;;  %vm553_vm13 = vcmp.eq.s32.totalorder %v2845_v10, 2 }
  0x2d   :  { %vm2869_vm7 = vmand %vm204_vm4, %vm156_vm3  ;;  %vm508_vm14 = vcmp.eq.s32.totalorder %v2847_v11, 2  ;;  %vm555_vm15 = vcmp.lt.s32.totalorder %v2845_v10, 2  ;;  %vm850_vm4 = vcmp.lt.s32.totalorder %v2847_v11, 3  ;;  %p2759_p5 = por %p2758_p4, %p2757_p3 }
  0x2e   :  { %2603 = vmatpush3.bf16.msra.mxu0 %v2835_v6  ;;  %vm207_vm8 = vmand %vm157_vm5, %vm206_vm6  ;;  %v2878_v35 = vsub.s32 %v179_v30, %v2845_v10  ;;  %vm896_vm5 = vcmp.eq.s32.totalorder %v2845_v10, 3  ;;  %vm851_vm6 = vcmp.eq.s32.totalorder %v2847_v11, 3 }
  0x2f   :  { %2470 = vmatprep.subr.mxu0 %v2784_v8  ;;  %vm554_vm1 = vmand %vm553_vm13, %vm507_vm12  ;;  %vm1193_vm13 = vcmp.lt.s32.totalorder %v2847_v11, 4  ;;  %p2760_p6 = pnand %p2759_p5, %p2753_p2 }
  0x31   :  { %2468 = vmatmul.mubr.msk.f32.vlgmr.msra.gmra.mrb[0].mxu0 %vm53_vm0, %v52_v7 }
  0x32   :  { %2472 = vmatprep.mubr.msk.f32.mxu0 %vm2786_vm11, %v2784_v8 }
 0x104   :  { %v2469_v13 = vpop.f32.mrb[0].mxu0 }
 0x105   :  { %v136_v15 = vmax.f32 %v2469_v13, 0.0  ;;  %v126_v16 = vpop.f32.mrb[1].mxu0 }
 0x106   :  { %v135_v17 = vmax.f32 %v126_v16, 0.0 }
 0x107   :  { %2476 = vmatpush3.msra.mxu1 %v136_v15  ;;  %v147_v19 = vrot.slane %v136_v15, %v142_v14 }
 0x108   :  { %2471 = vmatpush3.msra.mxu0 %v135_v17  ;;  %v143_v18 = vrot.slane %v135_v17, %v142_v14  ;;  %2605 = vmatprep.subr.bf16.mxu1 %v2833_v3  ;;  %v493_v14 = vsub.s32 2, %v2845_v10 }
 0x109   :  { %2491 = vmatprep.subr.mxu0 %v2784_v8  ;;  %v149_v22 = vmul.f32 %v147_v19, %v136_v15 }
 0x10a   :  { %v148_v20 = vmul.f32 %v143_v18, %v135_v17 }
 0x10b   :  { %v153_v23 = vsel %vm53_vm0, %v149_v22, 0.0 }
 0x10c   :  { %v150_v21 = vsel %vm53_vm0, %v148_v20, 0.0 }
 0x10d   :  { %151 = vadd.xlane.f32.xlu0 %v150_v21 }
 0x111   :  { %154 = vadd.xlane.f32.xlu0 %v153_v23 }
 0x19a   :  { %v152_v28 = vpop.xlane.xlu0 %151 }
 0x19b   :  { %v167_v29 = vrot.slane %v152_v28, %v2862_v24 }
 0x19d   :  { %v230_v31 = vsel %vm2869_vm7, %v167_v29, %v2359_v12 }
 0x19e   :  { %v234_v32 = vsel %vm207_vm8, %v152_v28, %v230_v31  ;;  %v155_v33 = vpop.xlane.xlu0 %154 }
 0x19f   :  { %v171_v36 = vrot.slane %v155_v33, %v2862_v24  ;;  %v236_v37 = vsel %vm137_vm2, %v234_v32, 0.0 }
 0x1a0   :  { %237 = vadd.xlane.f32.xlu1 %v236_v37  ;;  %v244_v47 = vrot.slane %v236_v37, 4 }
 0x1a1   :  { %v173_v38 = vsel %vm172_vm9, %v171_v36, %v167_v29  ;;  %v231_v39 = vsel %vm2869_vm7, %v171_v36, %v2359_v12  ;;  %v2367_v29 = vsel %vm508_vm14, 1.0, %v2784_v8  ;;  %vm898_vm7 = vcmp.lt.s32.totalorder %v2845_v10, 3 }
 0x1a2   :  { %v175_v40 = vsel %vm156_vm3, %v173_v38, %v2362_v34  ;;  %v235_v41 = vsel %vm207_vm8, %v155_v33, %v231_v39  ;;  %v245_v48 = vadd.f32 %v244_v47, %v236_v37  ;;  %vm556_vm3 = vmand %vm508_vm14, %vm555_vm15  ;;  %vm1239_vm14 = vcmp.eq.s32.totalorder %v2845_v10, 4 }
 0x1a3   :  { %v183_v42 = vrot.slane %v175_v40, %v2878_v35  ;;  %v239_v43 = vsel %vm137_vm2, %v235_v41, 0.0  ;;  %vm897_vm8 = vmand %vm896_vm5, %vm850_vm4  ;;  %vm1194_vm15 = vcmp.eq.s32.totalorder %v2847_v11, 4  ;;  %vm1536_vm5 = vcmp.lt.s32.totalorder %v2847_v11, 5 }
 0x1a4   :  { %240 = vadd.xlane.f32.xlu1 %v239_v43  ;;  %v250_v49 = vrot.slane %v239_v43, 4  ;;  %v246_v50 = vrot.slane %v245_v48, 2 }
 0x1a5   :  { %v184_v44 = vcombine.high %v183_v42, %v183_v42  ;;  %v191_v45 = vrot.slane %v183_v42, %v2878_v35 }
 0x1a6   :  { %v251_v51 = vadd.f32 %v250_v49, %v239_v43  ;;  %v247_v52 = vadd.f32 %v246_v50, %v245_v48 }
 0x1a7   :  { %v198_v46 = vrot.slane %v184_v44, %v2878_v35  ;;  %202 = vst.msk [vmem:[#allocation7 + $0x1] sm:$0x1] %vm201_vm10, %v191_v45 }
 0x1a8   :  { %v252_v53 = vrot.slane %v251_v51, 2  ;;  %v248_v54 = vrot.slane %v247_v52, 1 }
 0x1a9   :  { %203 = vst.msk [vmem:[#allocation7 + $0x9] sm:$0x1] %vm201_vm10, %v198_v46 }
 0x1aa   :  { %v253_v55 = vadd.f32 %v252_v53, %v251_v51  ;;  %v249_v56 = vadd.f32 %v248_v54, %v247_v52 }
 0x1ac   :  { %v254_v57 = vrot.slane %v253_v55, 1 }
 0x1ae   :  { %v255_v59 = vadd.f32 %v254_v57, %v253_v55 }
 0x22d   :  { %v238_v58 = vpop.xlane.xlu1 %237 }
 0x22e   :  { %2660 = vrsqrt.f32 %v238_v58 }
 0x22f   :  { %2662 = vrsqrt.f32 %v249_v56 }
 0x231   :  { %v241_v60 = vpop.xlane.xlu1 %240 }
 0x232   :  { %2664 = vrsqrt.f32 %v241_v60 }
 0x233   :  { %2666 = vrsqrt.f32 %v255_v59 }
 0x238   :  { %v2661_v61 = vpop.eup %2660 }
 0x239   :  { %v258_v62 = vmul.f32 %v2661_v61, %v234_v32  ;;  %v2663_v63 = vpop.eup %2662 }
 0x23b   :  { %v260_v0 = vmul.f32 %v2663_v63, %v258_v62 }
 0x23c   :  { %v2665_v1 = vpop.eup %2664 }
 0x23d   :  { %2473 = vmatmul.mubr.msk.f32.vlgmr.msra.gmra.mrb[2].mxu0 %vm137_vm2, %v260_v0  ;;  %v259_v2 = vmul.f32 %v2665_v1, %v235_v41  ;;  %v2667_v4 = vpop.eup %2666 }
 0x23e   :  { %2493 = vmatprep.mubr.msk.f32.mxu0 %vm2786_vm11, %v2784_v8 }
 0x23f   :  { %v261_v5 = vmul.f32 %v2667_v4, %v259_v2 }
 0x241   :  { %2478 = vmatmul.mubr.msk.f32.vlgmr.msra.gmra.mrb[0].mxu1 %vm137_vm2, %v261_v5 }
 0x242   :  { %2607 = vmatpush3.bf16.msra.mxu1 %v2833_v3 }
 0x243   :  { %2609 = vmatprep.subr.bf16.mxu1 %v2835_v6 }
 0x246   :  { %2611 = vmatpush3.bf16.msra.mxu1 %v2835_v6 }
 0x247   :  { %2613 = vmatprep.subr.bf16.mxu1 %v2833_v3 }
 0x310   :  { %v331_v7 = vpop.f32.mrb[2].mxu0 }
 0x311   :  { %v2474_v9 = vpop.f32.mrb[3].mxu0  ;;  %2488 = vmatprep.mubr.msk.f32.mxu1 %vm53_vm0, %v331_v7 }
 0x312   :  { %v836_v9 = vsub.s32 3, %v2845_v10 }
 0x314   :  { %v404_v12 = vpop.f32.mrb[0].mxu1 }
 0x315   :  { %v2479_v13 = vpop.f32.mrb[1].mxu1  ;;  %2489 = vmatmul.mubr.msk.f32.vlgmr.msra.gmra.mrb[2].mxu1 %vm53_vm0, %v404_v12 }
 0x316   :  { %2615 = vmatpush3.bf16.msra.mxu1 %v2833_v3 }
 0x317   :  { %2617 = vmatprep.subr.bf16.mxu1 %v2835_v6 }
 0x31a   :  { %2619 = vmatpush3.bf16.msra.mxu1 %v2835_v6 }
 0x31b   :  { %2621 = vmatprep.subr.bf16.mxu1 %v2833_v3 }
 0x3e8   :  { %v2490_v15 = vpop.f32.mrb[2].mxu1 }
 0x3e9   :  { %v2912_v16 = vmax.f32 %v2490_v15, 0.0  ;;  %v480_v17 = vpop.f32.mrb[3].mxu1 }
 0x3ea   :  { %v489_v18 = vmax.f32 %v480_v17, 0.0 }
 0x3eb   :  { %v498_v19 = vrot.slane %v2912_v16, %v493_v14 }
 0x3ec   :  { %2492 = vmatpush3.msra.mxu0 %v489_v18  ;;  %v494_v20 = vrot.slane %v489_v18, %v493_v14 }
 0x3ed   :  { %v500_v21 = vmul.f32 %v498_v19, %v2912_v16  ;;  %2496 = vmatprep.subr.mxu0 %v2784_v8 }
 0x3ee   :  { %v499_v22 = vmul.f32 %v494_v20, %v489_v18 }
 0x3ef   :  { %v504_v23 = vsel %vm53_vm0, %v500_v21, 0.0 }
 0x3f0   :  { %505 = vadd.xlane.f32.xlu1 %v504_v23  ;;  %v501_v25 = vsel %vm53_vm0, %v499_v22, 0.0 }
 0x3f1   :  { %502 = vadd.xlane.f32.xlu0 %v501_v25 }
 0x47d   :  { %v506_v26 = vpop.xlane.xlu1 %505 }
 0x47e   :  { %v522_v27 = vrot.slane %v506_v26, %v2862_v24  ;;  %v503_v28 = vpop.xlane.xlu0 %502 }
 0x47f   :  { %v518_v30 = vrot.slane %v503_v28, %v2862_v24 }
 0x480   :  { %v574_v31 = vsel %vm554_vm1, %v522_v27, %v261_v5 }
 0x481   :  { %v578_v32 = vsel %vm556_vm3, %v506_v26, %v574_v31  ;;  %v523_v33 = vsel %vm172_vm9, %v522_v27, %v518_v30  ;;  %v573_v34 = vsel %vm554_vm1, %v518_v30, %v260_v0  ;;  %v2372_v26 = vsel %vm851_vm6, 1.0, %v2784_v8 }
 0x482   :  { %v525_v36 = vsel %vm507_vm12, %v523_v33, %v2367_v29  ;;  %v577_v37 = vsel %vm556_vm3, %v503_v28, %v573_v34  ;;  %v582_v38 = vsel %vm137_vm2, %v578_v32, 0.0  ;;  %vm899_vm12 = vmand %vm851_vm6, %vm898_vm7  ;;  %vm1241_vm1 = vcmp.lt.s32.totalorder %v2845_v10, 4 }
 0x483   :  { %v533_v39 = vrot.slane %v525_v36, %v2878_v35  ;;  %583 = vadd.xlane.f32.xlu1 %v582_v38  ;;  %v579_v40 = vsel %vm137_vm2, %v577_v37, 0.0  ;;  %v593_v45 = vrot.slane %v582_v38, 4  ;;  %vm1240_vm3 = vmand %vm1239_vm14, %vm1193_vm13  ;;  %vm1582_vm6 = vcmp.eq.s32.totalorder %v2845_v10, 5 }
 0x484   :  { %580 = vadd.xlane.f32.xlu0 %v579_v40  ;;  %v587_v44 = vrot.slane %v579_v40, 4  ;;  %vm1537_vm7 = vcmp.eq.s32.totalorder %v2847_v11, 5  ;;  %vm1879_vm14 = vcmp.lt.s32.totalorder %v2847_v11, 6 }
 0x485   :  { %v534_v41 = vcombine.high %v533_v39, %v533_v39  ;;  %v541_v42 = vrot.slane %v533_v39, %v2878_v35  ;;  %v594_v47 = vadd.f32 %v593_v45, %v582_v38 }
 0x486   :  { %v588_v46 = vadd.f32 %v587_v44, %v579_v40 }
 0x487   :  { %v548_v43 = vrot.slane %v534_v41, %v2878_v35  ;;  %551 = vst.msk [vmem:[#allocation7 + $0x2] sm:$0x1] %vm201_vm10, %v541_v42  ;;  %v595_v49 = vrot.slane %v594_v47, 2 }
 0x488   :  { %v589_v48 = vrot.slane %v588_v46, 2 }
 0x489   :  { %552 = vst.msk [vmem:[#allocation7 + $0xa] sm:$0x1] %vm201_vm10, %v548_v43  ;;  %v596_v51 = vadd.f32 %v595_v49, %v594_v47 }
 0x48a   :  { %v590_v50 = vadd.f32 %v589_v48, %v588_v46 }
 0x48b   :  { %v597_v53 = vrot.slane %v596_v51, 1 }
 0x48c   :  { %v591_v52 = vrot.slane %v590_v50, 1 }
 0x48d   :  { %v598_v57 = vadd.f32 %v597_v53, %v596_v51 }
 0x48e   :  { %v592_v54 = vadd.f32 %v591_v52, %v590_v50 }
 0x510   :  { %v584_v55 = vpop.xlane.xlu1 %583 }
 0x511   :  { %2668 = vrsqrt.f32 %v584_v55  ;;  %v581_v56 = vpop.xlane.xlu0 %580 }
 0x512   :  { %2670 = vrsqrt.f32 %v581_v56 }
 0x513   :  { %2672 = vrsqrt.f32 %v592_v54 }
 0x514   :  { %2674 = vrsqrt.f32 %v598_v57 }
 0x51b   :  { %v2669_v58 = vpop.eup %2668 }
 0x51c   :  { %v2671_v59 = vpop.eup %2670  ;;  %v602_v62 = vmul.f32 %v2669_v58, %v578_v32 }
 0x51d   :  { %v601_v60 = vmul.f32 %v2671_v59, %v577_v37  ;;  %v2673_v61 = vpop.eup %2672 }
 0x51e   :  { %v2675_v0 = vpop.eup %2674 }
 0x51f   :  { %v603_v63 = vmul.f32 %v2673_v61, %v601_v60  ;;  %v604_v1 = vmul.f32 %v2675_v0, %v602_v62 }
 0x521   :  { %2494 = vmatmul.mubr.msk.f32.vlgmr.msra.gmra.mrb[4].mxu0 %vm137_vm2, %v603_v63 }
 0x522   :  { %2497 = vmatpush3.msra.mxu0 %v2912_v16  ;;  %2498 = vmatprep.mubr.msk.f32.mxu0 %vm2786_vm11, %v2784_v8 }
 0x523   :  { %2512 = vmatprep.subr.mxu0 %v2784_v8 }
 0x525   :  { %2499 = vmatmul.mubr.msk.f32.vlgmr.msra.gmra.mrb[6].mxu0 %vm137_vm2, %v604_v1 }
 0x526   :  { %2514 = vmatprep.mubr.msk.f32.mxu0 %vm2786_vm11, %v2784_v8 }
 0x5f4   :  { %v674_v2 = vpop.f32.mrb[4].mxu0 }
 0x5f5   :  { %v2495_v4 = vpop.f32.mrb[5].mxu0  ;;  %2509 = vmatprep.mubr.msk.f32.mxu1 %vm53_vm0, %v674_v2 }
 0x5f6   :  { %v1179_v4 = vsub.s32 4, %v2845_v10 }
 0x5f8   :  { %v747_v5 = vpop.f32.mrb[6].mxu0 }
 0x5f9   :  { %v2500_v7 = vpop.f32.mrb[7].mxu0  ;;  %2510 = vmatmul.mubr.msk.f32.vlgmr.msra.gmra.mrb[4].mxu1 %vm53_vm0, %v747_v5 }
 0x5fa   :  { %2623 = vmatpush3.bf16.msra.mxu1 %v2833_v3 }
 0x5fb   :  { %2625 = vmatprep.subr.bf16.mxu1 %v2835_v6 }
 0x5fe   :  { %2627 = vmatpush3.bf16.msra.mxu1 %v2835_v6 }
 0x5ff   :  { %2629 = vmatprep.subr.bf16.mxu1 %v2833_v3 }
 0x6cc   :  { %v2511_v12 = vpop.f32.mrb[4].mxu1 }
 0x6cd   :  { %v2949_v13 = vmax.f32 %v2511_v12, 0.0  ;;  %v823_v14 = vpop.f32.mrb[5].mxu1 }
 0x6ce   :  { %v832_v15 = vmax.f32 %v823_v14, 0.0 }
 0x6cf   :  { %v841_v16 = vrot.slane %v2949_v13, %v836_v9 }
 0x6d0   :  { %2513 = vmatpush3.msra.mxu0 %v832_v15  ;;  %v837_v17 = vrot.slane %v832_v15, %v836_v9 }
 0x6d1   :  { %v843_v18 = vmul.f32 %v841_v16, %v2949_v13  ;;  %2517 = vmatprep.subr.mxu0 %v2784_v8 }
 0x6d2   :  { %v842_v19 = vmul.f32 %v837_v17, %v832_v15 }
 0x6d3   :  { %v847_v20 = vsel %vm53_vm0, %v843_v18, 0.0 }
 0x6d4   :  { %848 = vadd.xlane.f32.xlu1 %v847_v20  ;;  %v844_v21 = vsel %vm53_vm0, %v842_v19, 0.0 }
 0x6d5   :  { %845 = vadd.xlane.f32.xlu0 %v844_v21 }
 0x761   :  { %v849_v22 = vpop.xlane.xlu1 %848 }
 0x762   :  { %v865_v23 = vrot.slane %v849_v22, %v2862_v24  ;;  %v846_v25 = vpop.xlane.xlu0 %845 }
 0x763   :  { %v861_v27 = vrot.slane %v846_v25, %v2862_v24 }
 0x764   :  { %v917_v28 = vsel %vm897_vm8, %v865_v23, %v604_v1 }
 0x765   :  { %v921_v29 = vsel %vm899_vm12, %v849_v22, %v917_v28  ;;  %v866_v30 = vsel %vm172_vm9, %v865_v23, %v861_v27  ;;  %v916_v31 = vsel %vm897_vm8, %v861_v27, %v603_v63  ;;  %v2377_v22 = vsel %vm1194_vm15, 1.0, %v2784_v8 }
 0x766   :  { %v868_v32 = vsel %vm850_vm4, %v866_v30, %v2372_v26  ;;  %v920_v33 = vsel %vm899_vm12, %v846_v25, %v916_v31  ;;  %v925_v34 = vsel %vm137_vm2, %v921_v29, 0.0  ;;  %vm1242_vm4 = vmand %vm1194_vm15, %vm1241_vm1  ;;  %vm1584_vm8 = vcmp.lt.s32.totalorder %v2845_v10, 5 }
 0x767   :  { %v876_v36 = vrot.slane %v868_v32, %v2878_v35  ;;  %926 = vadd.xlane.f32.xlu1 %v925_v34  ;;  %v922_v37 = vsel %vm137_vm2, %v920_v33, 0.0  ;;  %v936_v42 = vrot.slane %v925_v34, 4  ;;  %vm1583_vm12 = vmand %vm1582_vm6, %vm1536_vm5  ;;  %vm1925_vm15 = vcmp.eq.s32.totalorder %v2845_v10, 6 }
 0x768   :  { %923 = vadd.xlane.f32.xlu0 %v922_v37  ;;  %v930_v41 = vrot.slane %v922_v37, 4  ;;  %vm1880_vm1 = vcmp.eq.s32.totalorder %v2847_v11, 6  ;;  %vm2222_vm6 = vcmp.lt.s32.totalorder %v2847_v11, 7 }
 0x769   :  { %v877_v38 = vcombine.high %v876_v36, %v876_v36  ;;  %v884_v39 = vrot.slane %v876_v36, %v2878_v35  ;;  %v937_v44 = vadd.f32 %v936_v42, %v925_v34 }
 0x76a   :  { %v931_v43 = vadd.f32 %v930_v41, %v922_v37 }
 0x76b   :  { %v891_v40 = vrot.slane %v877_v38, %v2878_v35  ;;  %894 = vst.msk [vmem:[#allocation7 + $0x3] sm:$0x1] %vm201_vm10, %v884_v39  ;;  %v938_v46 = vrot.slane %v937_v44, 2 }
 0x76c   :  { %v932_v45 = vrot.slane %v931_v43, 2 }
 0x76d   :  { %895 = vst.msk [vmem:[#allocation7 + $0xb] sm:$0x1] %vm201_vm10, %v891_v40  ;;  %v939_v48 = vadd.f32 %v938_v46, %v937_v44 }
 0x76e   :  { %v933_v47 = vadd.f32 %v932_v45, %v931_v43 }
 0x76f   :  { %v940_v50 = vrot.slane %v939_v48, 1 }
 0x770   :  { %v934_v49 = vrot.slane %v933_v47, 1 }
 0x771   :  { %v941_v54 = vadd.f32 %v940_v50, %v939_v48 }
 0x772   :  { %v935_v51 = vadd.f32 %v934_v49, %v933_v47 }
 0x7f4   :  { %v927_v52 = vpop.xlane.xlu1 %926 }
 0x7f5   :  { %2676 = vrsqrt.f32 %v927_v52  ;;  %v924_v53 = vpop.xlane.xlu0 %923 }
 0x7f6   :  { %2678 = vrsqrt.f32 %v924_v53 }
 0x7f7   :  { %2680 = vrsqrt.f32 %v935_v51 }
 0x7f8   :  { %2682 = vrsqrt.f32 %v941_v54 }
 0x7ff   :  { %v2677_v55 = vpop.eup %2676 }
 0x800   :  { %v2679_v56 = vpop.eup %2678  ;;  %v945_v59 = vmul.f32 %v2677_v55, %v921_v29 }
 0x801   :  { %v944_v57 = vmul.f32 %v2679_v56, %v920_v33  ;;  %v2681_v58 = vpop.eup %2680 }
 0x802   :  { %v2683_v61 = vpop.eup %2682 }
 0x803   :  { %v946_v60 = vmul.f32 %v2681_v58, %v944_v57  ;;  %v947_v62 = vmul.f32 %v2683_v61, %v945_v59 }
 0x805   :  { %2515 = vmatmul.mubr.msk.f32.vlgmr.msra.gmra.mrb[8].mxu0 %vm137_vm2, %v946_v60 }
 0x806   :  { %2518 = vmatpush3.msra.mxu0 %v2949_v13  ;;  %2519 = vmatprep.mubr.msk.f32.mxu0 %vm2786_vm11, %v2784_v8 }
 0x807   :  { %2533 = vmatprep.subr.mxu0 %v2784_v8 }
 0x809   :  { %2520 = vmatmul.mubr.msk.f32.vlgmr.msra.gmra.mrb[10].mxu0 %vm137_vm2, %v947_v62 }
 0x80a   :  { %2535 = vmatprep.mubr.msk.f32.mxu0 %vm2786_vm11, %v2784_v8 }
 0x8d8   :  { %v1017_v63 = vpop.f32.mrb[8].mxu0 }
 0x8d9   :  { %v2516_v0 = vpop.f32.mrb[9].mxu0  ;;  %2530 = vmatprep.mubr.msk.f32.mxu1 %vm53_vm0, %v1017_v63 }
 0x8da   :  { %v1522_v0 = vsub.s32 5, %v2845_v10 }
 0x8dc   :  { %v1090_v1 = vpop.f32.mrb[10].mxu0 }
 0x8dd   :  { %v2521_v2 = vpop.f32.mrb[11].mxu0  ;;  %2531 = vmatmul.mubr.msk.f32.vlgmr.msra.gmra.mrb[6].mxu1 %vm53_vm0, %v1090_v1 }
 0x8de   :  { %2631 = vmatpush3.bf16.msra.mxu1 %v2833_v3 }
 0x8df   :  { %2633 = vmatprep.subr.bf16.mxu1 %v2835_v6 }
 0x8e2   :  { %2635 = vmatpush3.bf16.msra.mxu1 %v2835_v6 }
 0x8e3   :  { %2637 = vmatprep.subr.bf16.mxu1 %v2833_v3 }
 0x9b0   :  { %v2532_v5 = vpop.f32.mrb[6].mxu1 }
 0x9b1   :  { %v2986_v7 = vmax.f32 %v2532_v5, 0.0  ;;  %v1166_v9 = vpop.f32.mrb[7].mxu1 }
 0x9b2   :  { %v1175_v12 = vmax.f32 %v1166_v9, 0.0 }
 0x9b3   :  { %v1184_v13 = vrot.slane %v2986_v7, %v1179_v4 }
 0x9b4   :  { %2534 = vmatpush3.msra.mxu0 %v1175_v12  ;;  %v1180_v14 = vrot.slane %v1175_v12, %v1179_v4 }
 0x9b5   :  { %v1186_v15 = vmul.f32 %v1184_v13, %v2986_v7  ;;  %2538 = vmatprep.subr.mxu0 %v2784_v8 }
 0x9b6   :  { %v1185_v16 = vmul.f32 %v1180_v14, %v1175_v12 }
 0x9b7   :  { %v1190_v17 = vsel %vm53_vm0, %v1186_v15, 0.0 }
 0x9b8   :  { %1191 = vadd.xlane.f32.xlu1 %v1190_v17  ;;  %v1187_v18 = vsel %vm53_vm0, %v1185_v16, 0.0 }
 0x9b9   :  { %1188 = vadd.xlane.f32.xlu0 %v1187_v18 }
 0xa45   :  { %v1192_v19 = vpop.xlane.xlu1 %1191 }
 0xa46   :  { %v1208_v20 = vrot.slane %v1192_v19, %v2862_v24  ;;  %v1189_v21 = vpop.xlane.xlu0 %1188 }
 0xa47   :  { %v1204_v23 = vrot.slane %v1189_v21, %v2862_v24 }
 0xa48   :  { %v1260_v25 = vsel %vm1240_vm3, %v1208_v20, %v947_v62 }
 0xa49   :  { %v1264_v26 = vsel %vm1242_vm4, %v1192_v19, %v1260_v25  ;;  %v1209_v27 = vsel %vm172_vm9, %v1208_v20, %v1204_v23  ;;  %v1259_v28 = vsel %vm1240_vm3, %v1204_v23, %v946_v60  ;;  %v2382_v19 = vsel %vm1537_vm7, 1.0, %v2784_v8 }
 0xa4a   :  { %v1211_v29 = vsel %vm1193_vm13, %v1209_v27, %v2377_v22  ;;  %v1263_v30 = vsel %vm1242_vm4, %v1189_v21, %v1259_v28  ;;  %v1268_v31 = vsel %vm137_vm2, %v1264_v26, 0.0  ;;  %vm1585_vm13 = vmand %vm1537_vm7, %vm1584_vm8  ;;  %vm1927_vm3 = vcmp.lt.s32.totalorder %v2845_v10, 6 }
 0xa4b   :  { %v1219_v32 = vrot.slane %v1211_v29, %v2878_v35  ;;  %1269 = vadd.xlane.f32.xlu1 %v1268_v31  ;;  %v1265_v33 = vsel %vm137_vm2, %v1263_v30, 0.0  ;;  %v1279_v39 = vrot.slane %v1268_v31, 4  ;;  %vm1926_vm4 = vmand %vm1925_vm15, %vm1879_vm14 }
 0xa4c   :  { %1266 = vadd.xlane.f32.xlu0 %v1265_v33  ;;  %v1273_v38 = vrot.slane %v1265_v33, 4 }
 0xa4d   :  { %v1220_v34 = vcombine.high %v1219_v32, %v1219_v32  ;;  %v1227_v36 = vrot.slane %v1219_v32, %v2878_v35  ;;  %v1280_v41 = vadd.f32 %v1279_v39, %v1268_v31 }
 0xa4e   :  { %v1274_v40 = vadd.f32 %v1273_v38, %v1265_v33 }
 0xa4f   :  { %v1234_v37 = vrot.slane %v1220_v34, %v2878_v35  ;;  %1237 = vst.msk [vmem:[#allocation7 + $0x4] sm:$0x1] %vm201_vm10, %v1227_v36  ;;  %v1281_v43 = vrot.slane %v1280_v41, 2 }
 0xa50   :  { %v1275_v42 = vrot.slane %v1274_v40, 2 }
 0xa51   :  { %1238 = vst.msk [vmem:[#allocation7 + $0xc] sm:$0x1] %vm201_vm10, %v1234_v37  ;;  %v1282_v45 = vadd.f32 %v1281_v43, %v1280_v41 }
 0xa52   :  { %v1276_v44 = vadd.f32 %v1275_v42, %v1274_v40 }
 0xa53   :  { %v1283_v47 = vrot.slane %v1282_v45, 1 }
 0xa54   :  { %v1277_v46 = vrot.slane %v1276_v44, 1 }
 0xa55   :  { %v1284_v51 = vadd.f32 %v1283_v47, %v1282_v45 }
 0xa56   :  { %v1278_v48 = vadd.f32 %v1277_v46, %v1276_v44 }
 0xad8   :  { %v1270_v49 = vpop.xlane.xlu1 %1269 }
 0xad9   :  { %2684 = vrsqrt.f32 %v1270_v49  ;;  %v1267_v50 = vpop.xlane.xlu0 %1266 }
 0xada   :  { %2686 = vrsqrt.f32 %v1267_v50 }
 0xadb   :  { %2688 = vrsqrt.f32 %v1278_v48 }
 0xadc   :  { %2690 = vrsqrt.f32 %v1284_v51 }
 0xae3   :  { %v2685_v52 = vpop.eup %2684 }
 0xae4   :  { %v2687_v53 = vpop.eup %2686  ;;  %v1288_v56 = vmul.f32 %v2685_v52, %v1264_v26 }
 0xae5   :  { %v1287_v54 = vmul.f32 %v2687_v53, %v1263_v30  ;;  %v2689_v55 = vpop.eup %2688 }
 0xae6   :  { %v2691_v58 = vpop.eup %2690 }
 0xae7   :  { %v1289_v57 = vmul.f32 %v2689_v55, %v1287_v54  ;;  %v1290_v59 = vmul.f32 %v2691_v58, %v1288_v56 }
 0xae9   :  { %2536 = vmatmul.mubr.msk.f32.vlgmr.msra.gmra.mrb[12].mxu0 %vm137_vm2, %v1289_v57 }
 0xaea   :  { %2539 = vmatpush3.msra.mxu0 %v2986_v7  ;;  %2540 = vmatprep.mubr.msk.f32.mxu0 %vm2786_vm11, %v2784_v8 }
 0xaeb   :  { %2554 = vmatprep.subr.mxu0 %v2784_v8 }
 0xaed   :  { %2541 = vmatmul.mubr.msk.f32.vlgmr.msra.gmra.mrb[14].mxu0 %vm137_vm2, %v1290_v59 }
 0xaee   :  { %2556 = vmatprep.mubr.msk.f32.mxu0 %vm2786_vm11, %v2784_v8 }
 0xbbc   :  { %v1360_v60 = vpop.f32.mrb[12].mxu0 }
 0xbbd   :  { %v2537_v61 = vpop.f32.mrb[13].mxu0  ;;  %2551 = vmatprep.mubr.msk.f32.mxu1 %vm53_vm0, %v1360_v60 }
 0xbbe   :  { %v1865_v61 = vsub.s32 6, %v2845_v10 }
 0xbc0   :  { %v1433_v62 = vpop.f32.mrb[14].mxu0 }
 0xbc1   :  { %v2542_v63 = vpop.f32.mrb[15].mxu0  ;;  %2552 = vmatmul.mubr.msk.f32.vlgmr.msra.gmra.mrb[8].mxu1 %vm53_vm0, %v1433_v62 }
 0xbc2   :  { %2639 = vmatpush3.bf16.msra.mxu1 %v2833_v3 }
 0xbc3   :  { %2641 = vmatprep.subr.bf16.mxu1 %v2835_v6 }
 0xbc6   :  { %2643 = vmatpush3.bf16.msra.mxu1 %v2835_v6 }
 0xbc7   :  { %2645 = vmatprep.subr.bf16.mxu1 %v2833_v3 }
 0xc94   :  { %v2553_v1 = vpop.f32.mrb[8].mxu1 }
 0xc95   :  { %v3023_v2 = vmax.f32 %v2553_v1, 0.0  ;;  %v1509_v4 = vpop.f32.mrb[9].mxu1 }
 0xc96   :  { %v1518_v5 = vmax.f32 %v1509_v4, 0.0 }
 0xc97   :  { %v1527_v7 = vrot.slane %v3023_v2, %v1522_v0 }
 0xc98   :  { %2555 = vmatpush3.msra.mxu0 %v1518_v5  ;;  %v1523_v9 = vrot.slane %v1518_v5, %v1522_v0 }
 0xc99   :  { %v1529_v12 = vmul.f32 %v1527_v7, %v3023_v2  ;;  %2559 = vmatprep.subr.mxu0 %v2784_v8 }
 0xc9a   :  { %v1528_v13 = vmul.f32 %v1523_v9, %v1518_v5 }
 0xc9b   :  { %v1533_v14 = vsel %vm53_vm0, %v1529_v12, 0.0 }
 0xc9c   :  { %1534 = vadd.xlane.f32.xlu1 %v1533_v14  ;;  %v1530_v15 = vsel %vm53_vm0, %v1528_v13, 0.0  ;;  %v2387_v14 = vsel %vm1880_vm1, 1.0, %v2784_v8 }
 0xc9d   :  { %1531 = vadd.xlane.f32.xlu0 %v1530_v15 }
 0xd29   :  { %v1535_v16 = vpop.xlane.xlu1 %1534 }
 0xd2a   :  { %v1551_v17 = vrot.slane %v1535_v16, %v2862_v24  ;;  %v1532_v18 = vpop.xlane.xlu0 %1531 }
 0xd2b   :  { %v1547_v20 = vrot.slane %v1532_v18, %v2862_v24 }
 0xd2c   :  { %v1603_v21 = vsel %vm1583_vm12, %v1551_v17, %v1290_v59 }
 0xd2d   :  { %v1607_v22 = vsel %vm1585_vm13, %v1535_v16, %v1603_v21  ;;  %v1552_v23 = vsel %vm172_vm9, %v1551_v17, %v1547_v20  ;;  %v1602_v25 = vsel %vm1583_vm12, %v1547_v20, %v1289_v57 }
 0xd2e   :  { %v1554_v26 = vsel %vm1536_vm5, %v1552_v23, %v2382_v19  ;;  %v1606_v27 = vsel %vm1585_vm13, %v1532_v18, %v1602_v25  ;;  %v1611_v28 = vsel %vm137_vm2, %v1607_v22, 0.0  ;;  %vm1928_vm5 = vmand %vm1880_vm1, %vm1927_vm3 }
 0xd2f   :  { %v1562_v29 = vrot.slane %v1554_v26, %v2878_v35  ;;  %1612 = vadd.xlane.f32.xlu1 %v1611_v28  ;;  %v1608_v30 = vsel %vm137_vm2, %v1606_v27, 0.0  ;;  %v1622_v36 = vrot.slane %v1611_v28, 4 }
 0xd30   :  { %1609 = vadd.xlane.f32.xlu0 %v1608_v30  ;;  %v1616_v34 = vrot.slane %v1608_v30, 4 }
 0xd31   :  { %v1563_v31 = vcombine.high %v1562_v29, %v1562_v29  ;;  %v1570_v32 = vrot.slane %v1562_v29, %v2878_v35  ;;  %v1623_v38 = vadd.f32 %v1622_v36, %v1611_v28 }
 0xd32   :  { %v1617_v37 = vadd.f32 %v1616_v34, %v1608_v30 }
 0xd33   :  { %v1577_v33 = vrot.slane %v1563_v31, %v2878_v35  ;;  %1580 = vst.msk [vmem:[#allocation7 + $0x5] sm:$0x1] %vm201_vm10, %v1570_v32  ;;  %v1624_v40 = vrot.slane %v1623_v38, 2 }
 0xd34   :  { %v1618_v39 = vrot.slane %v1617_v37, 2 }
 0xd35   :  { %1581 = vst.msk [vmem:[#allocation7 + $0xd] sm:$0x1] %vm201_vm10, %v1577_v33  ;;  %v1625_v42 = vadd.f32 %v1624_v40, %v1623_v38 }
 0xd36   :  { %v1619_v41 = vadd.f32 %v1618_v39, %v1617_v37 }
 0xd37   :  { %v1626_v44 = vrot.slane %v1625_v42, 1 }
 0xd38   :  { %v1620_v43 = vrot.slane %v1619_v41, 1 }
 0xd39   :  { %v1627_v48 = vadd.f32 %v1626_v44, %v1625_v42 }
 0xd3a   :  { %v1621_v45 = vadd.f32 %v1620_v43, %v1619_v41 }
 0xdbc   :  { %v1613_v46 = vpop.xlane.xlu1 %1612 }
 0xdbd   :  { %2692 = vrsqrt.f32 %v1613_v46  ;;  %v1610_v47 = vpop.xlane.xlu0 %1609 }
 0xdbe   :  { %2694 = vrsqrt.f32 %v1610_v47 }
 0xdbf   :  { %2696 = vrsqrt.f32 %v1621_v45 }
 0xdc0   :  { %2698 = vrsqrt.f32 %v1627_v48 }
 0xdc7   :  { %v2693_v49 = vpop.eup %2692 }
 0xdc8   :  { %v2695_v50 = vpop.eup %2694  ;;  %v1631_v53 = vmul.f32 %v2693_v49, %v1607_v22 }
 0xdc9   :  { %v1630_v51 = vmul.f32 %v2695_v50, %v1606_v27  ;;  %v2697_v52 = vpop.eup %2696 }
 0xdca   :  { %v2699_v55 = vpop.eup %2698 }
 0xdcb   :  { %v1632_v54 = vmul.f32 %v2697_v52, %v1630_v51  ;;  %v1633_v56 = vmul.f32 %v2699_v55, %v1631_v53 }
 0xdcd   :  { %2557 = vmatmul.mubr.msk.f32.vlgmr.msra.gmra.mrb[16].mxu0 %vm137_vm2, %v1632_v54 }
 0xdce   :  { %2560 = vmatpush3.msra.mxu0 %v3023_v2  ;;  %2561 = vmatprep.mubr.msk.f32.mxu0 %vm2786_vm11, %v2784_v8 }
 0xdcf   :  { %2575 = vmatprep.subr.mxu0 %v2784_v8 }
 0xdd1   :  { %2562 = vmatmul.mubr.msk.f32.vlgmr.msra.gmra.mrb[18].mxu0 %vm137_vm2, %v1633_v56 }
 0xdd2   :  { %2577 = vmatprep.mubr.msk.f32.mxu0 %vm2786_vm11, %v2784_v8 }
 0xea0   :  { %v1703_v57 = vpop.f32.mrb[16].mxu0 }
 0xea1   :  { %v2558_v58 = vpop.f32.mrb[17].mxu0  ;;  %2572 = vmatprep.mubr.msk.f32.mxu1 %vm53_vm0, %v1703_v57 }
 0xea4   :  { %v1776_v59 = vpop.f32.mrb[18].mxu0 }
 0xea5   :  { %v2563_v60 = vpop.f32.mrb[19].mxu0  ;;  %2573 = vmatmul.mubr.msk.f32.vlgmr.msra.gmra.mrb[10].mxu1 %vm53_vm0, %v1776_v59 }
 0xea6   :  { %2647 = vmatpush3.bf16.msra.mxu1 %v2833_v3 }
 0xea7   :  { %2649 = vmatprep.subr.bf16.mxu1 %v2835_v6 }
 0xeaa   :  { %2651 = vmatpush3.bf16.msra.mxu1 %v2835_v6 }
 0xf78   :  { %v2574_v62 = vpop.f32.mrb[10].mxu1 }
 0xf79   :  { %v3059_v63 = vmax.f32 %v2574_v62, 0.0  ;;  %v1852_v0 = vpop.f32.mrb[11].mxu1 }
 0xf7a   :  { %v1861_v1 = vmax.f32 %v1852_v0, 0.0 }
 0xf7b   :  { %v1870_v2 = vrot.slane %v3059_v63, %v1865_v61 }
 0xf7c   :  { %2576 = vmatpush3.msra.mxu0 %v1861_v1  ;;  %v1866_v4 = vrot.slane %v1861_v1, %v1865_v61 }
 0xf7d   :  { %v1872_v5 = vmul.f32 %v1870_v2, %v3059_v63  ;;  %2580 = vmatprep.subr.mxu0 %v2784_v8 }
 0xf7e   :  { %v1871_v3 = vmul.f32 %v1866_v4, %v1861_v1 }
 0xf7f   :  { %v1876_v7 = vsel %vm53_vm0, %v1872_v5, 0.0 }
 0xf80   :  { %1877 = vadd.xlane.f32.xlu1 %v1876_v7  ;;  %v1873_v6 = vsel %vm53_vm0, %v1871_v3, 0.0 }
 0xf81   :  { %1874 = vadd.xlane.f32.xlu0 %v1873_v6 }
0x100d   :  { %v1878_v9 = vpop.xlane.xlu1 %1877 }
0x100e   :  { %v1894_v12 = vrot.slane %v1878_v9, %v2862_v24  ;;  %v1875_v13 = vpop.xlane.xlu0 %1874 }
0x100f   :  { %v1890_v15 = vrot.slane %v1875_v13, %v2862_v24 }
0x1010   :  { %v1946_v16 = vsel %vm1926_vm4, %v1894_v12, %v1633_v56  ;;  %v2208_v56 = vsub.s32 7, %v2845_v10 }
0x1011   :  { %v1950_v17 = vsel %vm1928_vm5, %v1878_v9, %v1946_v16  ;;  %v1895_v18 = vsel %vm172_vm9, %v1894_v12, %v1890_v15  ;;  %v1945_v19 = vsel %vm1926_vm4, %v1890_v15, %v1632_v54 }
0x1012   :  { %v1897_v20 = vsel %vm1879_vm14, %v1895_v18, %v2387_v14  ;;  %v1949_v21 = vsel %vm1928_vm5, %v1875_v13, %v1945_v19  ;;  %v1954_v22 = vsel %vm137_vm2, %v1950_v17, 0.0 }
0x1013   :  { %v1905_v23 = vrot.slane %v1897_v20, %v2878_v35  ;;  %1955 = vadd.xlane.f32.xlu1 %v1954_v22  ;;  %v1951_v25 = vsel %vm137_vm2, %v1949_v21, 0.0  ;;  %v1965_v30 = vrot.slane %v1954_v22, 4 }
0x1014   :  { %1952 = vadd.xlane.f32.xlu0 %v1951_v25  ;;  %v1959_v29 = vrot.slane %v1951_v25, 4 }
0x1015   :  { %v1906_v26 = vcombine.high %v1905_v23, %v1905_v23  ;;  %v1913_v27 = vrot.slane %v1905_v23, %v2878_v35  ;;  %v1966_v32 = vadd.f32 %v1965_v30, %v1954_v22 }
0x1016   :  { %v1960_v31 = vadd.f32 %v1959_v29, %v1951_v25 }
0x1017   :  { %v1920_v28 = vrot.slane %v1906_v26, %v2878_v35  ;;  %1923 = vst.msk [vmem:[#allocation7 + $0x6] sm:$0x1] %vm201_vm10, %v1913_v27  ;;  %v1967_v34 = vrot.slane %v1966_v32, 2 }
0x1018   :  { %v1961_v33 = vrot.slane %v1960_v31, 2 }
0x1019   :  { %1924 = vst.msk [vmem:[#allocation7 + $0xe] sm:$0x1] %vm201_vm10, %v1920_v28  ;;  %v1968_v37 = vadd.f32 %v1967_v34, %v1966_v32 }
0x101a   :  { %v1962_v36 = vadd.f32 %v1961_v33, %v1960_v31 }
0x101b   :  { %v1969_v39 = vrot.slane %v1968_v37, 1 }
0x101c   :  { %v1963_v38 = vrot.slane %v1962_v36, 1 }
0x101d   :  { %v1970_v43 = vadd.f32 %v1969_v39, %v1968_v37 }
0x101e   :  { %v1964_v40 = vadd.f32 %v1963_v38, %v1962_v36 }
0x10a0   :  { %v1956_v41 = vpop.xlane.xlu1 %1955 }
0x10a1   :  { %2700 = vrsqrt.f32 %v1956_v41  ;;  %v1953_v42 = vpop.xlane.xlu0 %1952 }
0x10a2   :  { %2702 = vrsqrt.f32 %v1953_v42 }
0x10a3   :  { %2704 = vrsqrt.f32 %v1964_v40 }
0x10a4   :  { %2706 = vrsqrt.f32 %v1970_v43 }
0x10ab   :  { %v2701_v44 = vpop.eup %2700 }
0x10ac   :  { %v2703_v45 = vpop.eup %2702  ;;  %v1974_v48 = vmul.f32 %v2701_v44, %v1950_v17 }
0x10ad   :  { %v1973_v46 = vmul.f32 %v2703_v45, %v1949_v21  ;;  %v2705_v47 = vpop.eup %2704 }
0x10ae   :  { %v2707_v50 = vpop.eup %2706 }
0x10af   :  { %v1975_v49 = vmul.f32 %v2705_v47, %v1973_v46  ;;  %v1976_v51 = vmul.f32 %v2707_v50, %v1974_v48 }
0x10b1   :  { %2578 = vmatmul.mubr.msk.f32.vlgmr.msra.gmra.mrb[20].mxu0 %vm137_vm2, %v1975_v49 }
0x10b2   :  { %2581 = vmatpush3.msra.mxu0 %v3059_v63  ;;  %2582 = vmatprep.mubr.msk.f32.mxu0 %vm2786_vm11, %v2784_v8  ;;  %vm2223_vm11 = vcmp.eq.s32.totalorder %v2847_v11, 7 }
0x10b3   :  { %v2392_v7 = vsel %vm2223_vm11, 1.0, %v2784_v8 }
0x10b5   :  { %2583 = vmatmul.mubr.msk.f32.vlgmr.msra.gmra.mrb[22].mxu0 %vm137_vm2, %v1976_v51 }
0x1184   :  { %v2046_v52 = vpop.f32.mrb[20].mxu0 }
0x1185   :  { %v2579_v53 = vpop.f32.mrb[21].mxu0  ;;  %2593 = vmatprep.mubr.msk.f32.mxu1 %vm53_vm0, %v2046_v52 }
0x1188   :  { %v2119_v54 = vpop.f32.mrb[22].mxu0 }
0x1189   :  { %v2584_v55 = vpop.f32.mrb[23].mxu0  ;;  %2594 = vmatmul.mubr.msk.f32.vlgmr.msra.gmra.mrb[12].mxu1 %vm53_vm0, %v2119_v54 }
0x125c   :  { %v2595_v57 = vpop.f32.mrb[12].mxu1 }
0x125d   :  { %v2205_v58 = vmax.f32 %v2595_v57, 0.0  ;;  %v2195_v59 = vpop.f32.mrb[13].mxu1 }
0x125e   :  { %v2204_v60 = vmax.f32 %v2195_v59, 0.0 }
0x125f   :  { %v2213_v61 = vrot.slane %v2205_v58, %v2208_v56 }
0x1260   :  { %v2209_v62 = vrot.slane %v2204_v60, %v2208_v56 }
0x1261   :  { %v2215_v63 = vmul.f32 %v2213_v61, %v2205_v58 }
0x1262   :  { %v2214_v0 = vmul.f32 %v2209_v62, %v2204_v60 }
0x1263   :  { %v2219_v1 = vsel %vm53_vm0, %v2215_v63, 0.0 }
0x1264   :  { %2220 = vadd.xlane.f32.xlu1 %v2219_v1  ;;  %v2216_v2 = vsel %vm53_vm0, %v2214_v0, 0.0  ;;  %vm2270_vm0 = vcmp.gt.s32.totalorder %v2847_v11, %v2845_v10 }
0x1265   :  { %2217 = vadd.xlane.f32.xlu0 %v2216_v2 }
0x12f1   :  { %v2221_v4 = vpop.xlane.xlu1 %2220 }
0x12f2   :  { %v2237_v5 = vrot.slane %v2221_v4, %v2862_v24  ;;  %v2218_v3 = vpop.xlane.xlu0 %2217 }
0x12f3   :  { %v2233_v6 = vrot.slane %v2218_v3, %v2862_v24 }
0x12f5   :  { %v2238_v9 = vsel %vm172_vm9, %v2237_v5, %v2233_v6 }
0x12f6   :  { %v2240_v12 = vsel %vm2222_vm6, %v2238_v9, %v2392_v7 }
0x12f7   :  { %v2248_v13 = vrot.slane %v2240_v12, %v2878_v35 }
0x12f9   :  { %v2249_v14 = vcombine.high %v2248_v13, %v2248_v13  ;;  %v2256_v15 = vrot.slane %v2248_v13, %v2878_v35 }
0x12fb   :  { %v2263_v16 = vrot.slane %v2249_v14, %v2878_v35  ;;  %2266 = vst.msk [vmem:[#allocation7 + $0x7] sm:$0x1] %vm201_vm10, %v2256_v15 }
0x12fd   :  { %2267 = vst.msk [vmem:[#allocation7 + $0xf] sm:$0x1] %vm201_vm10, %v2263_v16 }
0x1302   :  { %v2268_v17 = vld [vmem:[#allocation7] sm:$0xff] }
0x1303   :  { %2271 = vxpose.xlu0.b32.start.end [1/1] (short) (narrow) %v2268_v17, 8 }
0x1304   :  { %v2269_v18 = vld [vmem:[#allocation7 + $0x8] sm:$0xff] }
0x1305   :  { %2303 = vxpose.xlu1.b32.start.end [1/1] (short) (narrow) %v2269_v18, 8 }
0x1383   :  { %v2287_v8 = vpop.trf.xlu0 }
0x1384   :  { %v2337_v24 = vsel %vm2270_vm0, %v2287_v8, %v2268_v17 }
0x1385   :  { %2339 = vst.msk [vmem:[#allocation7] sm:$0xff] %vm137_vm2, %v2337_v24  ;;  %v2319_v19 = vpop.trf.xlu1 }
0x1386   :  { %v2338_v35 = vsel %vm2270_vm0, %v2319_v19, %v2269_v18 }
0x1387   :  { %2340 = vst.msk [vmem:[#allocation7 + $0x8] sm:$0xff] %vm137_vm2, %v2338_v35 }
0x1388   :  { %2763 = shalt.err (!%p2760_p6)
}
0x1389   :  { %s2764_s10 = scalar_lea.hbm %s3123_s2, 256 }
0x138a   :  { %p2765_p7 = scmp.ne.s32.totalorder %s3123_s2, %s2764_s10  ;;  %p2768_p8 = scmp.lt.u32.totalorder %s2764_s10, %s3123_s2 }
0x138c   :  { %p2770_p9 = pnand %p2768_p8, %p2765_p7 }
0x138e   :  { %2773 = shalt.err (!%p2770_p9)
}
0x138f   :  { %2352 = dma.vmem_to_hbm [thread:$0]  %s2347_s6, 256, %s3123_s2, [#allocation4], %s2781_s19, %s2781_s19, %s2782_s20  }
0x1390   :  { %2778 = dma.done.wait [#allocation4], 256  }
0x1391   :  { %2779 = vsyncadd [#allocation4], 4294967040 }
0x1392   :  { %2356 = vsyncpa [#allocation3], 1 }
0x1393   :  { %2357 = vsyncpa [#allocation6], 1 }
0x1394   :  { %2358 = vsyncpa [#allocation4], 1 }

</bundles_post_ra>
